<compile_context>
chip_gen: v7x
topology: tpu7x:2x2x1
jax: 0.10.0
libtpu: 0.0.40
codegen_flags: <defaults>
</compile_context>

<pallas_src>
import functools

import jax
import jax.numpy as jnp
from jax.experimental import pallas as pl
from jax.experimental.pallas import tpu as pltpu

_MIB = 1024 * 1024
try:
    _VMEM_CAP = int(getattr(pltpu.get_tpu_info(), "vmem_capacity_bytes", 64 * _MIB))
except Exception:  # pragma: no cover - conservative fallback if the query is unavailable
    _VMEM_CAP = 64 * _MIB
# ~half of physical VMEM, capped: 64 MiB on v5e/v6e (128 MiB parts), 32 MiB on v7x (64 MiB).
_VMEM_LIMIT = int(min(96 * _MIB, max(32 * _MIB, _VMEM_CAP // 2)))


def _conv_stats_kernel(x_ref, w_ref, y_ref, stats_ref, *, K, H, W, nb, inv_m):
    """Conv (kw-only im2col, accumulated over kh taps) + per-image BN partial stats.

    x_ref:     (nb, H+K-1, W+K-1, Cin)  spatially pre-padded images (compute dtype)
    w_ref:     (K, K*Cin, Cout_pad)     weight: one (kw,cin)-folded slab per kh tap
    y_ref:     (nb, Cout, H*W)          conv output, channel-major (lane-dense)
    stats_ref: (nb, 2, Cout_pad)        per-image [sum, centred sum of squares] (f32)
    """
    M = H * W
    Cout = y_ref.shape[1]
    for i in range(nb):                               # static unroll over images in step
        xp = x_ref[i]                                 # (Hp, Wp, Cin), staged once in VMEM
        acc = None
        for kh in range(K):                           # kw-only im2col, accumulate kh taps
            cols = [xp[kh:kh + H, kw:kw + W, :] for kw in range(K)]
            patch = jnp.concatenate(cols, axis=-1).reshape(M, -1)      # (M, K*Cin)
            part = jnp.dot(patch, w_ref[kh], preferred_element_type=jnp.float32)
            acc = part if acc is None else acc + part                  # (M, Cout_pad) f32
        # Per-image BN partials from the f32 accumulator (before the bf16 cast).
        ssum = jnp.sum(acc, axis=0, keepdims=True)                     # (1, Cout_pad)
        mu = ssum * inv_m
        cssq = jnp.sum(jnp.square(acc - mu), axis=0, keepdims=True)    # centred ssq
        stats_ref[i] = jnp.concatenate([ssum, cssq], axis=0)           # (2, Cout_pad)
        # Channel-major store: lane dim is M (>=128) -> dense stores + contiguous DMA,
        # and the HBM slab is already NCHW-ordered (no trailing XLA transpose needed).
        y_ref[i] = jnp.transpose(acc)[:Cout, :].astype(y_ref.dtype)
        # TODO(synk): for very large H*W tiles, chunk the stats/transpose over row blocks
        # (fori_loop) to bound f32 temporaries, and add an H-row tile grid with halo
        # slices so one image tile also fits v7x's 64 MiB VMEM.


def _images_per_step(N, Hp, Wp, Cin, M, Cout, Cout_pad, K, itemsize):
    """How many images to process per grid step within a conservative VMEM budget."""
    per_img = (Hp * Wp * Cin * itemsize          # input tile
               + M * K * Cin * itemsize          # one kh im2col patch
               + Cout * M * itemsize             # y tile (channel-major)
               + 3 * M * Cout_pad * 4)           # f32 accumulator + epilogue temporaries
    budget = 8 * _MIB                            # leaves headroom for double buffering
    nb = int(max(1, min(N, budget // max(per_img, 1))))
    while N % nb:
        nb -= 1
    return nb


@functools.partial(jax.jit, static_argnames=("kernel_size", "stride", "eps",
                                              "use_batch_norm", "compute_dtype"))
def unet_block_forward(x_nchw, weight_oikk, bias, gamma, beta, *,
                       kernel_size=3, stride=1, eps=1e-5, use_batch_norm=True,
                       compute_dtype=jnp.bfloat16):
    """UNetBlock.forward: conv(k, stride=1, pad=k//2) -> BN(batch stats) -> ReLU.

    NCHW in, NCHW out (f32). compute_dtype=jnp.float32 gives an f32 MXU path when
    tighter parity with the torch f32 conv is required.
    """
    assert stride == 1, "kernel implements the module's default stride=1 path"
    K = kernel_size
    assert K % 2 == 1, "odd kernel_size required for torch 'same'-style padding=K//2"
    N, Cin, H, W = x_nchw.shape
    Cout = weight_oikk.shape[0]
    pad = K // 2
    Hp, Wp = H + 2 * pad, W + 2 * pad
    M = H * W
    Cout_pad = -(-Cout // 128) * 128             # pad output channels to the MXU/lane width
    cdt = jnp.dtype(compute_dtype)

    # Glue (fused into one XLA pass by jit): NCHW->NHWC + cast + spatial zero pad;
    # weight (Cout,Cin,kh,kw) -> (kh, kw*Cin, Cout_pad) matching the kw-im2col tap order.
    xh = jnp.pad(jnp.transpose(x_nchw, (0, 2, 3, 1)).astype(cdt),
                 ((0, 0), (pad, pad), (pad, pad), (0, 0)))
    w_k = jnp.transpose(weight_oikk, (2, 3, 1, 0)).reshape(K, K * Cin, Cout)
    w_k = jnp.pad(w_k, ((0, 0), (0, 0), (0, Cout_pad - Cout))).astype(cdt)

    nb = _images_per_step(N, Hp, Wp, Cin, M, Cout, Cout_pad, K, cdt.itemsize)
    grid = (N // nb,)

    cost = pl.CostEstimate(
        flops=int(2 * N * M * (K * K * Cin) * Cout_pad),
        transcendentals=0,
        bytes_accessed=int(xh.size * cdt.itemsize + w_k.size * cdt.itemsize
                           + N * Cout * M * cdt.itemsize + N * 2 * Cout_pad * 4))
    cparams = pltpu.CompilerParams(
        dimension_semantics=("parallel",),        # image tiles shard across TensorCores
        vmem_limit_bytes=_VMEM_LIMIT)
    # TODO(synk): the constant-index weight block is still double-buffered by default; at
    # real channel counts stage it once (pl.Buffered(1) / manual copy) to reclaim its
    # second buffer of VMEM on v7x.

    y, stats = pl.pallas_call(
        functools.partial(_conv_stats_kernel, K=K, H=H, W=W, nb=nb, inv_m=1.0 / M),
        grid=grid,
        in_specs=[
            pl.BlockSpec((nb, Hp, Wp, Cin), lambda n: (n, 0, 0, 0)),
            pl.BlockSpec((K, K * Cin, Cout_pad), lambda n: (0, 0, 0)),
        ],
        out_specs=(
            pl.BlockSpec((nb, Cout, M), lambda n: (n, 0, 0)),
            pl.BlockSpec((nb, 2, Cout_pad), lambda n: (n, 0, 0)),
        ),
        out_shape=(
            jax.ShapeDtypeStruct((N, Cout, M), cdt),
            jax.ShapeDtypeStruct((N, 2, Cout_pad), jnp.float32),
        ),
        compiler_params=cparams,
        cost_estimate=cost,
    )(xh, w_k)

    # Fold BN (training-mode batch stats) or the conv bias into one (scale, shift) pair.
    if use_batch_norm:
        # The conv bias cancels exactly under training-mode batch norm -> never touched.
        count = N * M
        sum_i = stats[:, 0, :Cout]                 # (N, Cout) per-image sums
        cssq_i = stats[:, 1, :Cout]                # per-image centred sums of squares
        mean = jnp.sum(sum_i, axis=0) / count
        mu_i = sum_i / M
        # Chan parallel-variance combination (biased variance, training-mode BN).
        var = (jnp.sum(cssq_i, axis=0)
               + M * jnp.sum(jnp.square(mu_i - mean), axis=0)) / count
        inv_std = jax.lax.rsqrt(jnp.maximum(var, 0.0) + eps)
        scale = gamma.astype(jnp.float32) * inv_std
        shift = beta.astype(jnp.float32) - mean * scale
        # TODO(synk): running-mean/var buffer updates (torch training-mode side effect)
        # and eval-mode BN (running statistics) are not emitted.
    else:
        scale = jnp.ones((Cout,), jnp.float32)
        shift = bias.astype(jnp.float32)

    # Epilogue: relu(y*scale+shift). y is already channel-major, so this fuses with the
    # final metadata reshape into ONE elementwise XLA pass (no transpose, one HBM trip).
    out = jnp.maximum(y.astype(jnp.float32) * scale[None, :, None]
                      + shift[None, :, None], 0.0)
    return out.reshape(N, Cout, H, W)


def _reference(x_nchw, weight_oikk, bias, gamma, beta, *, eps=1e-5,
               use_batch_norm=True, matmul_dtype=None):
    """Pure-JAX reference for UNetBlock.forward (training-mode BN).

    If matmul_dtype is given, conv inputs are rounded to that dtype first so the
    reference sees the same values the kernel feeds the MXU.
    """
    xf = x_nchw.astype(jnp.float32)
    wf = weight_oikk.astype(jnp.float32)
    if matmul_dtype is not None:
        xf = xf.astype(matmul_dtype).astype(jnp.float32)
        wf = wf.astype(matmul_dtype).astype(jnp.float32)
    y = jax.lax.conv_general_dilated(
        xf, wf, window_strides=(1, 1), padding="SAME",
        dimension_numbers=("NCHW", "OIHW", "NCHW"),
        preferred_element_type=jnp.float32)
    y = y + bias.reshape(1, -1, 1, 1)
    if use_batch_norm:
        mean = jnp.mean(y, axis=(0, 2, 3), keepdims=True)
        var = jnp.mean((y - mean) ** 2, axis=(0, 2, 3), keepdims=True)
        y = (y - mean) * jax.lax.rsqrt(var + eps)
        y = y * gamma.reshape(1, -1, 1, 1) + beta.reshape(1, -1, 1, 1)
    return jnp.maximum(y, 0.0)


if __name__ == "__main__":
    # Small shapes consistent with the module: batch=2, in_channels=4, out_channels=8,
    # spatial=16x16, kernel_size=3, stride=1.
    N, Cin, Cout, H, W, K = 2, 4, 8, 16, 16, 3

    key = jax.random.PRNGKey(0)
    k_x, k_w, k_b, k_g, k_be = jax.random.split(key, 5)

    x = jax.random.normal(k_x, (N, Cin, H, W), dtype=jnp.float32)
    weight = jax.random.normal(k_w, (Cout, Cin, K, K), dtype=jnp.float32) * 0.1
    bias = jax.random.normal(k_b, (Cout,), dtype=jnp.float32) * 0.1
    gamma = 1.0 + 0.1 * jax.random.normal(k_g, (Cout,), dtype=jnp.float32)
    beta = 0.1 * jax.random.normal(k_be, (Cout,), dtype=jnp.float32)

    out = unet_block_forward(x, weight, bias, gamma, beta, kernel_size=K)
    out = jax.block_until_ready(out)
    assert out.shape == (N, Cout, H, W)

    # Tight check vs. a reference whose conv inputs are rounded to bf16 (what the MXU
    # sees; y is additionally stored in bf16), plus a looser f32 sanity check.
    ref_bf16 = _reference(x, weight, bias, gamma, beta, matmul_dtype=jnp.bfloat16)
    ref_f32 = _reference(x, weight, bias, gamma, beta)
    assert jnp.allclose(out, ref_bf16, atol=2e-2, rtol=2e-2), "mismatch vs bf16-matched reference"
    assert jnp.allclose(out, ref_f32, atol=8e-2, rtol=8e-2), "mismatch vs f32 reference"

    # use_batch_norm=False path: conv + bias + ReLU.
    out_nb = unet_block_forward(x, weight, bias, gamma, beta, kernel_size=K,
                                use_batch_norm=False)
    out_nb = jax.block_until_ready(out_nb)
    ref_nb = _reference(x, weight, bias, gamma, beta, use_batch_norm=False,
                        matmul_dtype=jnp.bfloat16)
    assert jnp.allclose(out_nb, ref_nb, atol=2e-2, rtol=2e-2), "mismatch (no-BN path)"

    print("KERNEL_OK")
</pallas_src>

<mosaic_0001>
module attributes {stable_mosaic.version = 11 : i64} {
  func.func @_conv_stats_kernel(%arg0: i32, %arg1: memref<2x18x18x4xbf16, #tpu.memory_space<vmem>>, %arg2: memref<3x12x128xbf16, #tpu.memory_space<vmem>>, %arg3: memref<2x8x256xbf16, #tpu.memory_space<vmem>>, %arg4: memref<2x2x128xf32, #tpu.memory_space<vmem>>) attributes {dimension_semantics = [#tpu.dimension_semantics<parallel>], iteration_bounds = array<i64: 1>, scalar_prefetch = 0 : i64, scratch_operands = 0 : i64, tpu.core_type = #tpu.core_type<tc>, window_params = [{transform_indices = @transform_0, window_bounds = array<i64: 2, 18, 18, 4>}, {pipeline_mode = #tpu.pipeline_mode<synchronous>, transform_indices = @transform_1, window_bounds = array<i64: 3, 12, 128>}, {transform_indices = @transform_2, window_bounds = array<i64: 2, 8, 256>}, {transform_indices = @transform_3, window_bounds = array<i64: 2, 2, 128>}]} {
    %c0 = arith.constant 0 : index
    %c0_0 = arith.constant 0 : index
    %c0_1 = arith.constant 0 : index
    %c0_2 = arith.constant 0 : index
    %0 = vector.load %arg1[%c0, %c0_0, %c0_1, %c0_2] : memref<2x18x18x4xbf16, #tpu.memory_space<vmem>>, vector<1x18x18x4xbf16>
    %1 = vector.shape_cast %0 : vector<1x18x18x4xbf16> to vector<18x18x4xbf16>
    %2 = vector.extract_strided_slice %1 {offsets = [0, 0, 0], sizes = [16, 16, 4], strides = [1, 1, 1]} : vector<18x18x4xbf16> to vector<16x16x4xbf16>
    %3 = vector.extract_strided_slice %1 {offsets = [0, 1, 0], sizes = [16, 16, 4], strides = [1, 1, 1]} : vector<18x18x4xbf16> to vector<16x16x4xbf16>
    %4 = vector.extract_strided_slice %1 {offsets = [0, 2, 0], sizes = [16, 16, 4], strides = [1, 1, 1]} : vector<18x18x4xbf16> to vector<16x16x4xbf16>
    %5 = tpu.concatenate %2, %3, %4 in 2 : vector<16x16x4xbf16>, vector<16x16x4xbf16>, vector<16x16x4xbf16> -> vector<16x16x12xbf16>
    %6 = vector.shape_cast %5 : vector<16x16x12xbf16> to vector<256x12xbf16>
    %c0_3 = arith.constant 0 : index
    %c0_4 = arith.constant 0 : index
    %c0_5 = arith.constant 0 : index
    %7 = vector.load %arg2[%c0_3, %c0_4, %c0_5] : memref<3x12x128xbf16, #tpu.memory_space<vmem>>, vector<1x12x128xbf16>
    %8 = vector.shape_cast %7 : vector<1x12x128xbf16> to vector<12x128xbf16>
    %cst = arith.constant dense<0.000000e+00> : vector<256x128xf32>
    %9 = tpu.matmul %6, %8, %cst {dimension_numbers = #tpu.dot_dimension_numbers<[1], [0], [0], [1], [0, 0, 1, 1], [], []>} : vector<256x12xbf16>, vector<12x128xbf16>, vector<256x128xf32> -> vector<256x128xf32>
    %10 = vector.extract_strided_slice %1 {offsets = [1, 0, 0], sizes = [16, 16, 4], strides = [1, 1, 1]} : vector<18x18x4xbf16> to vector<16x16x4xbf16>
    %11 = vector.extract_strided_slice %1 {offsets = [1, 1, 0], sizes = [16, 16, 4], strides = [1, 1, 1]} : vector<18x18x4xbf16> to vector<16x16x4xbf16>
    %12 = vector.extract_strided_slice %1 {offsets = [1, 2, 0], sizes = [16, 16, 4], strides = [1, 1, 1]} : vector<18x18x4xbf16> to vector<16x16x4xbf16>
    %13 = tpu.concatenate %10, %11, %12 in 2 : vector<16x16x4xbf16>, vector<16x16x4xbf16>, vector<16x16x4xbf16> -> vector<16x16x12xbf16>
    %14 = vector.shape_cast %13 : vector<16x16x12xbf16> to vector<256x12xbf16>
    %c1 = arith.constant 1 : index
    %c0_6 = arith.constant 0 : index
    %c0_7 = arith.constant 0 : index
    %15 = vector.load %arg2[%c1, %c0_6, %c0_7] : memref<3x12x128xbf16, #tpu.memory_space<vmem>>, vector<1x12x128xbf16>
    %16 = vector.shape_cast %15 : vector<1x12x128xbf16> to vector<12x128xbf16>
    %cst_8 = arith.constant dense<0.000000e+00> : vector<256x128xf32>
    %17 = tpu.matmul %14, %16, %cst_8 {dimension_numbers = #tpu.dot_dimension_numbers<[1], [0], [0], [1], [0, 0, 1, 1], [], []>} : vector<256x12xbf16>, vector<12x128xbf16>, vector<256x128xf32> -> vector<256x128xf32>
    %18 = arith.addf %9, %17 : vector<256x128xf32>
    %19 = vector.extract_strided_slice %1 {offsets = [2, 0, 0], sizes = [16, 16, 4], strides = [1, 1, 1]} : vector<18x18x4xbf16> to vector<16x16x4xbf16>
    %20 = vector.extract_strided_slice %1 {offsets = [2, 1, 0], sizes = [16, 16, 4], strides = [1, 1, 1]} : vector<18x18x4xbf16> to vector<16x16x4xbf16>
    %21 = vector.extract_strided_slice %1 {offsets = [2, 2, 0], sizes = [16, 16, 4], strides = [1, 1, 1]} : vector<18x18x4xbf16> to vector<16x16x4xbf16>
    %22 = tpu.concatenate %19, %20, %21 in 2 : vector<16x16x4xbf16>, vector<16x16x4xbf16>, vector<16x16x4xbf16> -> vector<16x16x12xbf16>
    %23 = vector.shape_cast %22 : vector<16x16x12xbf16> to vector<256x12xbf16>
    %c2 = arith.constant 2 : index
    %c0_9 = arith.constant 0 : index
    %c0_10 = arith.constant 0 : index
    %24 = vector.load %arg2[%c2, %c0_9, %c0_10] : memref<3x12x128xbf16, #tpu.memory_space<vmem>>, vector<1x12x128xbf16>
    %25 = vector.shape_cast %24 : vector<1x12x128xbf16> to vector<12x128xbf16>
    %cst_11 = arith.constant dense<0.000000e+00> : vector<256x128xf32>
    %26 = tpu.matmul %23, %25, %cst_11 {dimension_numbers = #tpu.dot_dimension_numbers<[1], [0], [0], [1], [0, 0, 1, 1], [], []>} : vector<256x12xbf16>, vector<12x128xbf16>, vector<256x128xf32> -> vector<256x128xf32>
    %27 = arith.addf %18, %26 : vector<256x128xf32>
    %cst_12 = arith.constant dense<0.000000e+00> : vector<128xf32>
    %28 = vector.multi_reduction <add>, %27, %cst_12 [0] : vector<256x128xf32> to vector<128xf32>
    %29 = vector.shape_cast %28 : vector<128xf32> to vector<1x128xf32>
    %cst_13 = arith.constant 3.906250e-03 : f32
    %30 = vector.broadcast %cst_13 : f32 to vector<1x128xf32>
    %31 = arith.mulf %29, %30 : vector<1x128xf32>
    %32 = vector.broadcast %31 : vector<1x128xf32> to vector<256x128xf32>
    %33 = arith.subf %27, %32 : vector<256x128xf32>
    %34 = arith.mulf %33, %33 : vector<256x128xf32>
    %cst_14 = arith.constant dense<0.000000e+00> : vector<128xf32>
    %35 = vector.multi_reduction <add>, %34, %cst_14 [0] : vector<256x128xf32> to vector<128xf32>
    %36 = vector.shape_cast %35 : vector<128xf32> to vector<1x128xf32>
    %37 = tpu.concatenate %29, %36 in 0 : vector<1x128xf32>, vector<1x128xf32> -> vector<2x128xf32>
    %c0_15 = arith.constant 0 : index
    %c0_16 = arith.constant 0 : index
    %c0_17 = arith.constant 0 : index
    %38 = vector.load %arg4[%c0_15, %c0_16, %c0_17] : memref<2x2x128xf32, #tpu.memory_space<vmem>>, vector<1x2x128xf32>
    %39 = vector.shape_cast %38 : vector<1x2x128xf32> to vector<2x128xf32>
    %40 = vector.shape_cast %37 : vector<2x128xf32> to vector<1x2x128xf32>
    tpu.vector_store %arg4[%c0_15, %c0_16, %c0_17], %40 {strides = array<i32>} : memref<2x2x128xf32, #tpu.memory_space<vmem>>, vector<1x2x128xf32>,
    %41 = tpu.transpose %27, [1, 0] : vector<256x128xf32> -> vector<128x256xf32>
    %42 = vector.extract_strided_slice %41 {offsets = [0, 0], sizes = [8, 256], strides = [1, 1]} : vector<128x256xf32> to vector<8x256xf32>
    %43 = arith.truncf %42 : vector<8x256xf32> to vector<8x256xbf16>
    %c0_18 = arith.constant 0 : index
    %c0_19 = arith.constant 0 : index
    %c0_20 = arith.constant 0 : index
    %44 = vector.load %arg3[%c0_18, %c0_19, %c0_20] : memref<2x8x256xbf16, #tpu.memory_space<vmem>>, vector<1x8x256xbf16>
    %45 = vector.shape_cast %44 : vector<1x8x256xbf16> to vector<8x256xbf16>
    %46 = vector.shape_cast %43 : vector<8x256xbf16> to vector<1x8x256xbf16>
    tpu.vector_store %arg3[%c0_18, %c0_19, %c0_20], %46 {strides = array<i32>} : memref<2x8x256xbf16, #tpu.memory_space<vmem>>, vector<1x8x256xbf16>,
    %c1_21 = arith.constant 1 : index
    %c0_22 = arith.constant 0 : index
    %c0_23 = arith.constant 0 : index
    %c0_24 = arith.constant 0 : index
    %47 = vector.load %arg1[%c1_21, %c0_22, %c0_23, %c0_24] : memref<2x18x18x4xbf16, #tpu.memory_space<vmem>>, vector<1x18x18x4xbf16>
    %48 = vector.shape_cast %47 : vector<1x18x18x4xbf16> to vector<18x18x4xbf16>
    %49 = vector.extract_strided_slice %48 {offsets = [0, 0, 0], sizes = [16, 16, 4], strides = [1, 1, 1]} : vector<18x18x4xbf16> to vector<16x16x4xbf16>
    %50 = vector.extract_strided_slice %48 {offsets = [0, 1, 0], sizes = [16, 16, 4], strides = [1, 1, 1]} : vector<18x18x4xbf16> to vector<16x16x4xbf16>
    %51 = vector.extract_strided_slice %48 {offsets = [0, 2, 0], sizes = [16, 16, 4], strides = [1, 1, 1]} : vector<18x18x4xbf16> to vector<16x16x4xbf16>
    %52 = tpu.concatenate %49, %50, %51 in 2 : vector<16x16x4xbf16>, vector<16x16x4xbf16>, vector<16x16x4xbf16> -> vector<16x16x12xbf16>
    %53 = vector.shape_cast %52 : vector<16x16x12xbf16> to vector<256x12xbf16>
    %c0_25 = arith.constant 0 : index
    %c0_26 = arith.constant 0 : index
    %c0_27 = arith.constant 0 : index
    %54 = vector.load %arg2[%c0_25, %c0_26, %c0_27] : memref<3x12x128xbf16, #tpu.memory_space<vmem>>, vector<1x12x128xbf16>
    %55 = vector.shape_cast %54 : vector<1x12x128xbf16> to vector<12x128xbf16>
    %cst_28 = arith.constant dense<0.000000e+00> : vector<256x128xf32>
    %56 = tpu.matmul %53, %55, %cst_28 {dimension_numbers = #tpu.dot_dimension_numbers<[1], [0], [0], [1], [0, 0, 1, 1], [], []>} : vector<256x12xbf16>, vector<12x128xbf16>, vector<256x128xf32> -> vector<256x128xf32>
    %57 = vector.extract_strided_slice %48 {offsets = [1, 0, 0], sizes = [16, 16, 4], strides = [1, 1, 1]} : vector<18x18x4xbf16> to vector<16x16x4xbf16>
    %58 = vector.extract_strided_slice %48 {offsets = [1, 1, 0], sizes = [16, 16, 4], strides = [1, 1, 1]} : vector<18x18x4xbf16> to vector<16x16x4xbf16>
    %59 = vector.extract_strided_slice %48 {offsets = [1, 2, 0], sizes = [16, 16, 4], strides = [1, 1, 1]} : vector<18x18x4xbf16> to vector<16x16x4xbf16>
    %60 = tpu.concatenate %57, %58, %59 in 2 : vector<16x16x4xbf16>, vector<16x16x4xbf16>, vector<16x16x4xbf16> -> vector<16x16x12xbf16>
    %61 = vector.shape_cast %60 : vector<16x16x12xbf16> to vector<256x12xbf16>
    %c1_29 = arith.constant 1 : index
    %c0_30 = arith.constant 0 : index
    %c0_31 = arith.constant 0 : index
    %62 = vector.load %arg2[%c1_29, %c0_30, %c0_31] : memref<3x12x128xbf16, #tpu.memory_space<vmem>>, vector<1x12x128xbf16>
    %63 = vector.shape_cast %62 : vector<1x12x128xbf16> to vector<12x128xbf16>
    %cst_32 = arith.constant dense<0.000000e+00> : vector<256x128xf32>
    %64 = tpu.matmul %61, %63, %cst_32 {dimension_numbers = #tpu.dot_dimension_numbers<[1], [0], [0], [1], [0, 0, 1, 1], [], []>} : vector<256x12xbf16>, vector<12x128xbf16>, vector<256x128xf32> -> vector<256x128xf32>
    %65 = arith.addf %56, %64 : vector<256x128xf32>
    %66 = vector.extract_strided_slice %48 {offsets = [2, 0, 0], sizes = [16, 16, 4], strides = [1, 1, 1]} : vector<18x18x4xbf16> to vector<16x16x4xbf16>
    %67 = vector.extract_strided_slice %48 {offsets = [2, 1, 0], sizes = [16, 16, 4], strides = [1, 1, 1]} : vector<18x18x4xbf16> to vector<16x16x4xbf16>
    %68 = vector.extract_strided_slice %48 {offsets = [2, 2, 0], sizes = [16, 16, 4], strides = [1, 1, 1]} : vector<18x18x4xbf16> to vector<16x16x4xbf16>
    %69 = tpu.concatenate %66, %67, %68 in 2 : vector<16x16x4xbf16>, vector<16x16x4xbf16>, vector<16x16x4xbf16> -> vector<16x16x12xbf16>
    %70 = vector.shape_cast %69 : vector<16x16x12xbf16> to vector<256x12xbf16>
    %c2_33 = arith.constant 2 : index
    %c0_34 = arith.constant 0 : index
    %c0_35 = arith.constant 0 : index
    %71 = vector.load %arg2[%c2_33, %c0_34, %c0_35] : memref<3x12x128xbf16, #tpu.memory_space<vmem>>, vector<1x12x128xbf16>
    %72 = vector.shape_cast %71 : vector<1x12x128xbf16> to vector<12x128xbf16>
    %cst_36 = arith.constant dense<0.000000e+00> : vector<256x128xf32>
    %73 = tpu.matmul %70, %72, %cst_36 {dimension_numbers = #tpu.dot_dimension_numbers<[1], [0], [0], [1], [0, 0, 1, 1], [], []>} : vector<256x12xbf16>, vector<12x128xbf16>, vector<256x128xf32> -> vector<256x128xf32>
    %74 = arith.addf %65, %73 : vector<256x128xf32>
    %cst_37 = arith.constant dense<0.000000e+00> : vector<128xf32>
    %75 = vector.multi_reduction <add>, %74, %cst_37 [0] : vector<256x128xf32> to vector<128xf32>
    %76 = vector.shape_cast %75 : vector<128xf32> to vector<1x128xf32>
    %cst_38 = arith.constant 3.906250e-03 : f32
    %77 = vector.broadcast %cst_38 : f32 to vector<1x128xf32>
    %78 = arith.mulf %76, %77 : vector<1x128xf32>
    %79 = vector.broadcast %78 : vector<1x128xf32> to vector<256x128xf32>
    %80 = arith.subf %74, %79 : vector<256x128xf32>
    %81 = arith.mulf %80, %80 : vector<256x128xf32>
    %cst_39 = arith.constant dense<0.000000e+00> : vector<128xf32>
    %82 = vector.multi_reduction <add>, %81, %cst_39 [0] : vector<256x128xf32> to vector<128xf32>
    %83 = vector.shape_cast %82 : vector<128xf32> to vector<1x128xf32>
    %84 = tpu.concatenate %76, %83 in 0 : vector<1x128xf32>, vector<1x128xf32> -> vector<2x128xf32>
    %c1_40 = arith.constant 1 : index
    %c0_41 = arith.constant 0 : index
    %c0_42 = arith.constant 0 : index
    %85 = vector.load %arg4[%c1_40, %c0_41, %c0_42] : memref<2x2x128xf32, #tpu.memory_space<vmem>>, vector<1x2x128xf32>
    %86 = vector.shape_cast %85 : vector<1x2x128xf32> to vector<2x128xf32>
    %87 = vector.shape_cast %84 : vector<2x128xf32> to vector<1x2x128xf32>
    tpu.vector_store %arg4[%c1_40, %c0_41, %c0_42], %87 {strides = array<i32>} : memref<2x2x128xf32, #tpu.memory_space<vmem>>, vector<1x2x128xf32>,
    %88 = tpu.transpose %74, [1, 0] : vector<256x128xf32> -> vector<128x256xf32>
    %89 = vector.extract_strided_slice %88 {offsets = [0, 0], sizes = [8, 256], strides = [1, 1]} : vector<128x256xf32> to vector<8x256xf32>
    %90 = arith.truncf %89 : vector<8x256xf32> to vector<8x256xbf16>
    %c1_43 = arith.constant 1 : index
    %c0_44 = arith.constant 0 : index
    %c0_45 = arith.constant 0 : index
    %91 = vector.load %arg3[%c1_43, %c0_44, %c0_45] : memref<2x8x256xbf16, #tpu.memory_space<vmem>>, vector<1x8x256xbf16>
    %92 = vector.shape_cast %91 : vector<1x8x256xbf16> to vector<8x256xbf16>
    %93 = vector.shape_cast %90 : vector<8x256xbf16> to vector<1x8x256xbf16>
    tpu.vector_store %arg3[%c1_43, %c0_44, %c0_45], %93 {strides = array<i32>} : memref<2x8x256xbf16, #tpu.memory_space<vmem>>, vector<1x8x256xbf16>,
    return
  }
  func.func @transform_0(%arg0: i32) -> (i32, i32, i32, i32) {
    %c0_i32 = arith.constant 0 : i32
    %c0_i32_0 = arith.constant 0 : i32
    %c0_i32_1 = arith.constant 0 : i32
    %c0_i32_2 = arith.constant 0 : i32
    return %arg0, %c0_i32, %c0_i32_0, %c0_i32_1 : i32, i32, i32, i32
  }
  func.func @transform_1(%arg0: i32) -> (i32, i32, i32) {
    %c0_i32 = arith.constant 0 : i32
    %c0_i32_0 = arith.constant 0 : i32
    %c0_i32_1 = arith.constant 0 : i32
    %c0_i32_2 = arith.constant 0 : i32
    return %c0_i32, %c0_i32_0, %c0_i32_1 : i32, i32, i32
  }
  func.func @transform_2(%arg0: i32) -> (i32, i32, i32) {
    %c0_i32 = arith.constant 0 : i32
    %c0_i32_0 = arith.constant 0 : i32
    %c0_i32_1 = arith.constant 0 : i32
    return %arg0, %c0_i32, %c0_i32_0 : i32, i32, i32
  }
  func.func @transform_3(%arg0: i32) -> (i32, i32, i32) {
    %c0_i32 = arith.constant 0 : i32
    %c0_i32_0 = arith.constant 0 : i32
    %c0_i32_1 = arith.constant 0 : i32
    return %arg0, %c0_i32, %c0_i32_0 : i32, i32, i32
  }
}

</mosaic_0001>

<bundles_post_ra>
// kernel: unet_block_forward.1
= control target key start
LH: loop header
LB: loop body
LE: loop exit
PB: predicated region body
PF: predicated region fallthrough
CT: control target
= control target key end

     0   :  { %vm421_vm0 = vcmask 1046528   ;;  %vm196_vm1 = vsmask.f32 7424  ;;  %s3699_s22 = smov 8   ;;  %s3700_s6 = smov 4   ;;  %vm642_vm2 = vcmask 1045504   ;;  %s5161_s0 = inlined_call_operand.vmem [shape: bf16[2,18,18,4], index: 0, kind: input, shape index: {}]   ;;  %s5162_s1 = inlined_call_operand.vmem [shape: bf16[3,12,128], index: 1, kind: input, shape index: {}]   ;;  %s5163_s2 = inlined_call_operand.vmem [shape: bf16[2,8,256], index: 2, kind: output, shape index: {0}]   ;;  %s5164_s3 = inlined_call_operand.vmem [shape: f32[2,2,128], index: 3, kind: output, shape index: {1}]  }
   0x1   :  { %v3606_v0 = vld [vmem:[%s5161_s0 + $0xc] sm:$0xff]   ;;  %v3607_v1 = vld [vmem:[%s5161_s0 + $0x14] ss:$0 sps:$4 sm:$0x11]   ;;  %v3608_v2 = vld [vmem:[%s5161_s0 + $0xe4] sm:$0xff]   ;;  %vm502_vm3 = vcmask 31744  }
   0x2   :  { %v425_v3 = vrot.slane %v3606_v0, 1  ;;  %v426_v4 = vrot.slane %v3607_v1, 1  ;;  %v3609_v5 = vld [vmem:[%s5161_s0 + $0xec] ss:$0 sps:$4 sm:$0x11]   ;;  %v210_v6 = vshrl.u32 %v3606_v0, 16 }
   0x3   :  { %v1840_v7 = vrot.slane %v3608_v2, 1  ;;  %v212_v8 = vshll.u32 %v3606_v0, 16  ;;  %v217_v9 = vshll.u32 %v3607_v1, 16  ;;  %v3736_v10 = vld [vmem:[%s5161_s0 + $0x18] sm:$0xff]   ;;  %v1841_v12 = vrot.slane %v3609_v5, 1  ;;  %v3612_v22 = vld [vmem:[%s5161_s0 + $0xf0] sm:$0xff]  }
   0x4   :  { %v427_v11 = vsel %vm421_vm0, %v425_v3, %v426_v4  ;;  %v1626_v13 = vshrl.u32 %v3608_v2, 16  ;;  %v3743_v16 = vld [vmem:[%s5161_s0 + $0x20] ss:$0 sps:$4 sm:$0x11]   ;;  %v222_v17 = vshrl.u32 %v3736_v10, 16  ;;  %v224_v19 = vshll.u32 %v3736_v10, 16 }
   0x5   :  { %472 = vrot.lane.b32.xlu1 %v427_v11, %s3699_s22  ;;  %v214_v14 = vrot.slane %v212_v8, 1  ;;  %v219_v15 = vrot.slane %v217_v9, 1  ;;  %v1842_v18 = vsel %vm421_vm0, %v1840_v7, %v1841_v12  ;;  %v1628_v20 = vshll.u32 %v3608_v2, 16  ;;  %v3755_v25 = vld [vmem:[%s5161_s0 + $0xfc] sm:$0xff]   ;;  %v3616_v34 = vld [vmem:[%s5161_s0 + $0x24] sm:$0xff]   ;;  %v3781_v50 = vld [vmem:[%s5161_s0 + $0x30] sm:$0xff]  }
   0x6   :  { %v1633_v21 = vshll.u32 %v3609_v5, 16  ;;  %v229_v24 = vshll.u32 %v3743_v16, 16  ;;  %v226_v26 = vrot.slane %v224_v19, 1  ;;  %v3613_v29 = vld [vmem:[%s5161_s0 + $0xf8] ss:$0 sps:$4 sm:$0x11]  }
   0x7   :  { %v215_v23 = vor.u32 %v214_v14, %v210_v6  ;;  %v1630_v27 = vrot.slane %v1628_v20, 1  ;;  %v1843_v32 = vrot.slane %v3612_v22, 1  ;;  %v1638_v33 = vshrl.u32 %v3612_v22, 16  ;;  %v3769_v40 = vld [vmem:[%s5161_s0 + $0x104] ss:$0 sps:$4 sm:$0x11]  }
   0x8   :  { %v1635_v28 = vrot.slane %v1633_v21, 1  ;;  %v231_v31 = vrot.slane %v229_v24, 1  ;;  %v227_v35 = vor.u32 %v226_v26, %v222_v17  ;;  %v1844_v37 = vrot.slane %v3613_v29, 1  ;;  %v3617_v54 = vld [vmem:[%s5161_s0 + $0x2c] ss:$0 sps:$4 sm:$0x11]  }
   0x9   :  { %1887 = vrot.lane.b32.xlu1 %v1842_v18, %s3699_s22  ;;  %v220_v30 = vsel %vm196_vm1, %v215_v23, %v219_v15  ;;  %v1631_v36 = vor.u32 %v1630_v27, %v1626_v13  ;;  %v1640_v38 = vshll.u32 %v3612_v22, 16  ;;  %v1645_v39 = vshll.u32 %v3613_v29, 16  ;;  %v3620_v62 = vld [vmem:[%s5161_s0 + $0x108] sm:$0xff]   ;;  %v3797_v1 = vld [vmem:[%s5161_s0 + $0x38] ss:$0 sps:$4 sm:$0x11]  }
   0xa   :  { %391 = vrot.lane.b32.xlu0 %v220_v30, %s3700_s6  ;;  %v1650_v41 = vshrl.u32 %v3755_v25, 16  ;;  %v1652_v42 = vshll.u32 %v3755_v25, 16  ;;  %v232_v43 = vsel %vm196_vm1, %v227_v35, %v231_v31  ;;  %v1845_v46 = vsel %vm421_vm0, %v1843_v32, %v1844_v37  ;;  %v3621_v9 = vld [vmem:[%s5161_s0 + $0x110] ss:$0 sps:$4 sm:$0x11]   ;;  %v3814_v15 = vld [vmem:[%s5161_s0 + $0x114] sm:$0xff]  }
   0xb   :  { %v1636_v44 = vsel %vm196_vm1, %v1631_v36, %v1635_v28  ;;  %v1642_v45 = vrot.slane %v1640_v38, 1  ;;  %v1647_v47 = vrot.slane %v1645_v39, 1  ;;  %v1657_v49 = vshll.u32 %v3769_v40, 16  ;;  %v3822_v19 = vld [vmem:[%s5161_s0 + $0x11c] ss:$0 sps:$4 sm:$0x11]  }
   0xc   :  { %v1654_v48 = vrot.slane %v1652_v42, 1  ;;  %v428_v52 = vrot.slane %v3736_v10, 1  ;;  %v429_v53 = vrot.slane %v3743_v16, 1  ;;  %v431_v55 = vrot.slane %v3616_v34, 1  ;;  %v3624_v24 = vld [vmem:[%s5161_s0 + $0x3c] sm:$0xff]   ;;  %v3840_v36 = vld [vmem:[%s5161_s0 + $0x48] sm:$0xff]  }
   0xd   :  { %393 = vrot.lane.b32.xlu1 %v232_v43, %s3700_s6  ;;  %v1643_v51 = vor.u32 %v1642_v45, %v1638_v33  ;;  %v1659_v57 = vrot.slane %v1657_v49, 1  ;;  %v234_v58 = vshrl.u32 %v3616_v34, 16  ;;  %v236_v59 = vshll.u32 %v3616_v34, 16  ;;  %v3625_v28 = vld [vmem:[%s5161_s0 + $0x44] ss:$0 sps:$4 sm:$0x11]  }
   0xe   :  { %1807 = vrot.lane.b32.xlu0 %v1636_v44, %s3700_s6  ;;  %v1655_v56 = vor.u32 %v1654_v48, %v1650_v41  ;;  %v241_v61 = vshll.u32 %v3617_v54, 16  ;;  %v432_v63 = vrot.slane %v3617_v54, 1  ;;  %v246_v2 = vshrl.u32 %v3781_v50, 16  ;;  %v3848_v43 = vld [vmem:[%s5161_s0 + $0x50] ss:$0 sps:$4 sm:$0x11]  }
   0xf   :  { %v1648_v60 = vsel %vm196_vm1, %v1643_v51, %v1647_v47  ;;  %v238_v0 = vrot.slane %v236_v59, 1  ;;  %v248_v5 = vshll.u32 %v3781_v50, 16  ;;  %v430_v6 = vsel %vm421_vm0, %v428_v52, %v429_v53  ;;  %v3628_v48 = vld [vmem:[%s5161_s0 + $0x120] sm:$0xff]   ;;  %v3862_v53 = vld [vmem:[%s5161_s0 + $0x12c] sm:$0xff]  }
  0x10   :  { %v1660_v3 = vsel %vm196_vm1, %v1655_v56, %v1659_v57  ;;  %v243_v4 = vrot.slane %v241_v61, 1  ;;  %v253_v8 = vshll.u32 %v3797_v1, 16  ;;  %v1664_v11 = vshll.u32 %v3620_v62, 16  ;;  %v3629_v57 = vld [vmem:[%s5161_s0 + $0x128] ss:$0 sps:$4 sm:$0x11]  }
  0x11   :  { %1889 = vrot.lane.b32.xlu1 %v1845_v46, %s3699_s22  ;;  %v239_v7 = vor.u32 %v238_v0, %v234_v58  ;;  %v250_v10 = vrot.slane %v248_v5, 1  ;;  %v1846_v12 = vrot.slane %v3755_v25, 1  ;;  %v1847_v13 = vrot.slane %v3769_v40, 1 }
  0x12   :  { %1809 = vrot.lane.b32.xlu0 %v1648_v60, %s3700_s6  ;;  %v1662_v14 = vshrl.u32 %v3620_v62, 16  ;;  %v433_v16 = vsel %vm421_vm0, %v431_v55, %v432_v63  ;;  %v255_v18 = vrot.slane %v253_v8, 1  ;;  %v1666_v21 = vrot.slane %v1664_v11, 1  ;;  %v3632_v8 = vld [vmem:[%s5161_s0 + $0x54] sm:$0xff]  }
  0x13   :  { %v244_v17 = vsel %vm196_vm1, %v239_v7, %v243_v4  ;;  %v251_v20 = vor.u32 %v250_v10, %v246_v2  ;;  %v1669_v22 = vshll.u32 %v3621_v9, 16  ;;  %v1676_v23 = vshll.u32 %v3814_v15, 16 }
  0x14   :  { %v1681_v25 = vshll.u32 %v3822_v19, 16  ;;  %v1674_v26 = vshrl.u32 %v3814_v15, 16  ;;  %v1848_v29 = vsel %vm421_vm0, %v1846_v12, %v1847_v13  ;;  %v1849_v30 = vrot.slane %v3620_v62, 1 }
  0x15   :  { %1811 = vrot.lane.b32.xlu1 %v1660_v3, %s3700_s6  ;;  %v1678_v27 = vrot.slane %v1676_v23, 1  ;;  %v1850_v31 = vrot.slane %v3621_v9, 1  ;;  %v260_v32 = vshll.u32 %v3624_v24, 16  ;;  %v256_v33 = vsel %vm196_vm1, %v251_v20, %v255_v18  ;;  %v3881_v3 = vld [vmem:[%s5161_s0 + $0x134] ss:$0 sps:$4 sm:$0x11]  }
  0x16   :  { %474 = vrot.lane.b32.xlu0 %v430_v6, %s3699_s22  ;;  %v1667_v34 = vor.u32 %v1666_v21, %v1662_v14  ;;  %v1671_v35 = vrot.slane %v1669_v22, 1  ;;  %v1683_v37 = vrot.slane %v1681_v25, 1  ;;  %v258_v39 = vshrl.u32 %v3624_v24, 16  ;;  %v3898_v20 = vld [vmem:[%s5161_s0 + $0x60] sm:$0xff]  }
  0x17   :  { %v1679_v38 = vor.u32 %v1678_v27, %v1674_v26  ;;  %v265_v40 = vshll.u32 %v3625_v28, 16  ;;  %v1851_v41 = vsel %vm421_vm0, %v1849_v30, %v1850_v31  ;;  %v262_v42 = vrot.slane %v260_v32, 1 }
  0x18   :  { %v1672_v44 = vsel %vm196_vm1, %v1667_v34, %v1671_v35  ;;  %v434_v45 = vrot.slane %v3781_v50, 1  ;;  %v435_v46 = vrot.slane %v3797_v1, 1  ;;  %v272_v47 = vshll.u32 %v3840_v36, 16 }
  0x19   :  { %476 = vrot.lane.b32.xlu1 %v433_v16, %s3699_s22  ;;  %v1684_v49 = vsel %vm196_vm1, %v1679_v38, %v1683_v37  ;;  %v437_v51 = vrot.slane %v3624_v24, 1  ;;  %v438_v52 = vrot.slane %v3625_v28, 1  ;;  %v263_v50 = vor.u32 %v262_v42, %v258_v39  ;;  %v3906_v24 = vld [vmem:[%s5161_s0 + $0x68] ss:$0 sps:$4 sm:$0x11]   ;;  %v3913_v28 = vld [vmem:[%s5161_s0 + $0x138] sm:$0xff]  }
  0x1a   :  { %395 = vrot.lane.b32.xlu0 %v244_v17, %s3700_s6  ;;  %v267_v54 = vrot.slane %v265_v40, 1  ;;  %v270_v55 = vshrl.u32 %v3840_v36, 16  ;;  %v277_v56 = vshll.u32 %v3848_v43, 16  ;;  %v436_v58 = vsel %vm421_vm0, %v434_v45, %v435_v46  ;;  %v3926_v39 = vld [vmem:[%s5161_s0 + $0x144] sm:$0xff]  }
  0x1b   :  { %v274_v59 = vrot.slane %v272_v47, 1  ;;  %v1688_v60 = vshll.u32 %v3628_v48, 16  ;;  %v1852_v61 = vrot.slane %v3814_v15, 1  ;;  %v1853_v62 = vrot.slane %v3822_v19, 1 }
  0x1c   :  { %v1700_v63 = vshll.u32 %v3862_v53, 16  ;;  %v439_v0 = vsel %vm421_vm0, %v437_v51, %v438_v52  ;;  %v268_v1 = vsel %vm196_vm1, %v263_v50, %v267_v54  ;;  %v279_v2 = vrot.slane %v277_v56, 1  ;;  %v3633_v15 = vld [vmem:[%s5161_s0 + $0x5c] ss:$0 sps:$4 sm:$0x11]   ;;  %v3948_v56 = vld [vmem:[%s5161_s0 + $0x6c] sm:$0xff]  }
  0x1d   :  { %1891 = vrot.lane.b32.xlu1 %v1848_v29, %s3699_s22  ;;  %v275_v4 = vor.u32 %v274_v59, %v270_v55  ;;  %v1686_v5 = vshrl.u32 %v3628_v48, 16  ;;  %v1690_v6 = vrot.slane %v1688_v60, 1  ;;  %v1693_v7 = vshll.u32 %v3629_v57, 16 }
  0x1e   :  { %397 = vrot.lane.b32.xlu0 %v256_v33, %s3700_s6  ;;  %v1855_v9 = vrot.slane %v3628_v48, 1  ;;  %v1856_v10 = vrot.slane %v3629_v57, 1  ;;  %v1698_v11 = vshrl.u32 %v3862_v53, 16  ;;  %v1702_v12 = vrot.slane %v1700_v63, 1 }
  0x1f   :  { %v1854_v13 = vsel %vm421_vm0, %v1852_v61, %v1853_v62  ;;  %v1705_v14 = vshll.u32 %v3881_v3, 16  ;;  %v280_v16 = vsel %vm196_vm1, %v275_v4, %v279_v2  ;;  %v1691_v17 = vor.u32 %v1690_v6, %v1686_v5  ;;  %v3939_v48 = vld [vmem:[%s5161_s0 + $0x14c] ss:$0 sps:$4 sm:$0x11]  }
  0x20   :  { %v1695_v18 = vrot.slane %v1693_v7, 1  ;;  %v284_v19 = vshll.u32 %v3632_v8, 16  ;;  %v440_v21 = vrot.slane %v3840_v36, 1  ;;  %v441_v22 = vrot.slane %v3848_v43, 1 }
  0x21   :  { %1893 = vrot.lane.b32.xlu1 %v1851_v41, %s3699_s22  ;;  %v282_v23 = vshrl.u32 %v3632_v8, 16  ;;  %v1857_v25 = vsel %vm421_vm0, %v1855_v9, %v1856_v10  ;;  %v1703_v26 = vor.u32 %v1702_v12, %v1698_v11  ;;  %v1707_v27 = vrot.slane %v1705_v14, 1  ;;  %v3641_v61 = vld [vmem:[%s5161_s0 + $0x74] ss:$0 sps:$4 sm:$0x11]  }
  0x22   :  { %1813 = vrot.lane.b32.xlu0 %v1672_v44, %s3700_s6  ;;  %v1696_v29 = vsel %vm196_vm1, %v1691_v17, %v1695_v18  ;;  %v286_v30 = vrot.slane %v284_v19, 1  ;;  %v289_v31 = vshll.u32 %v3633_v15, 16  ;;  %v296_v32 = vshll.u32 %v3898_v20, 16  ;;  %v3637_v44 = vld [vmem:[%s5161_s0 + $0x140] ss:$0 sps:$4 sm:$0x11]  }
  0x23   :  { %v443_v33 = vrot.slane %v3632_v8, 1  ;;  %v444_v34 = vrot.slane %v3633_v15, 1  ;;  %v1708_v35 = vsel %vm196_vm1, %v1703_v26, %v1707_v27  ;;  %v442_v36 = vsel %vm421_vm0, %v440_v21, %v441_v22  ;;  %v3975_v12 = vld [vmem:[%s5161_s0 + $0x80] ss:$0 sps:$4 sm:$0x11]  }
  0x24   :  { %v301_v37 = vshll.u32 %v3906_v24, 16  ;;  %v1712_v38 = vshll.u32 %v3913_v28, 16  ;;  %v287_v40 = vor.u32 %v286_v30, %v282_v23  ;;  %v291_v41 = vrot.slane %v289_v31, 1  ;;  %v3645_v27 = vld [vmem:[%s5161_s0 + $0x158] ss:$0 sps:$4 sm:$0x11]  }
  0x25   :  { %1815 = vrot.lane.b32.xlu1 %v1684_v49, %s3700_s6  ;;  %v294_v42 = vshrl.u32 %v3898_v20, 16  ;;  %v298_v43 = vrot.slane %v296_v32, 1  ;;  %v1858_v45 = vrot.slane %v3862_v53, 1  ;;  %v445_v46 = vsel %vm421_vm0, %v443_v33, %v444_v34  ;;  %v4004_v31 = vld [vmem:[%s5161_s0 + $0x164] ss:$0 sps:$4 sm:$0x11]  }
  0x26   :  { %478 = vrot.lane.b32.xlu0 %v436_v58, %s3699_s22  ;;  %v1859_v47 = vrot.slane %v3881_v3, 1  ;;  %v303_v49 = vrot.slane %v301_v37, 1  ;;  %v1710_v51 = vshrl.u32 %v3913_v28, 16  ;;  %v1714_v52 = vrot.slane %v1712_v38, 1  ;;  %v4015_v37 = vld [vmem:[%s5161_s0 + $0x84] sm:$0xff]  }
  0x27   :  { %v1724_v50 = vshll.u32 %v3926_v39, 16  ;;  %v292_v53 = vsel %vm196_vm1, %v287_v40, %v291_v41  ;;  %v299_v54 = vor.u32 %v298_v43, %v294_v42  ;;  %v1717_v55 = vshll.u32 %v3637_v44, 16 }
  0x28   :  { %v1861_v57 = vrot.slane %v3913_v28, 1  ;;  %v1862_v58 = vrot.slane %v3637_v44, 1  ;;  %v1722_v59 = vshrl.u32 %v3926_v39, 16  ;;  %v1729_v60 = vshll.u32 %v3939_v48, 16 }
  0x29   :  { %480 = vrot.lane.b32.xlu1 %v439_v0, %s3699_s22  ;;  %v1860_v62 = vsel %vm421_vm0, %v1858_v45, %v1859_v47  ;;  %v1726_v63 = vrot.slane %v1724_v50, 1  ;;  %v3962_v0 = vld [vmem:[%s5161_s0 + $0x78] sm:$0xff]   ;;  %v1715_v2 = vor.u32 %v1714_v52, %v1710_v51  ;;  %v1719_v3 = vrot.slane %v1717_v55, 1 }
  0x2a   :  { %399 = vrot.lane.b32.xlu0 %v268_v1, %s3700_s6  ;;  %v304_v1 = vsel %vm196_vm1, %v299_v54, %v303_v49  ;;  %v308_v4 = vshll.u32 %v3948_v56, 16  ;;  %v446_v5 = vrot.slane %v3898_v20, 1  ;;  %v1863_v6 = vsel %vm421_vm0, %v1861_v57, %v1862_v58  ;;  %v3649_v49 = vld [vmem:[%s5161_s0 + $0x8c] ss:$0 sps:$4 sm:$0x11]   ;;  %v4032_v54 = vld [vmem:[%s5161_s0 + $0x90] sm:$0xff]  }
  0x2b   :  { %v1731_v7 = vrot.slane %v1729_v60, 1  ;;  %v447_v8 = vrot.slane %v3906_v24, 1  ;;  %v1727_v9 = vor.u32 %v1726_v63, %v1722_v59  ;;  %v306_v10 = vshrl.u32 %v3948_v56, 16  ;;  %v3993_v24 = vld [vmem:[%s5161_s0 + $0x15c] sm:$0xff]  }
  0x2c   :  { %v313_v11 = vshll.u32 %v3641_v61, 16  ;;  %v1720_v14 = vsel %vm196_vm1, %v1715_v2, %v1719_v3  ;;  %v310_v15 = vrot.slane %v308_v4, 1  ;;  %v449_v17 = vrot.slane %v3948_v56, 1  ;;  %v4037_v55 = vld [vmem:[%s5161_s0 + $0x98] ss:$0 sps:$4 sm:$0x11]  }
  0x2d   :  { %1895 = vrot.lane.b32.xlu1 %v1854_v13, %s3699_s22  ;;  %v320_v13 = vshll.u32 %v3962_v0, 16  ;;  %v450_v18 = vrot.slane %v3641_v61, 1  ;;  %v318_v19 = vshrl.u32 %v3962_v0, 16  ;;  %v1732_v20 = vsel %vm196_vm1, %v1727_v9, %v1731_v7  ;;  %v4050_v4 = vld [vmem:[%s5161_s0 + $0x168] sm:$0xff]  }
  0x2e   :  { %401 = vrot.lane.b32.xlu0 %v280_v16, %s3700_s6  ;;  %v3982_v16 = vld [vmem:[%s5161_s0 + $0x150] sm:$0xff]   ;;  %v315_v21 = vrot.slane %v313_v11, 1  ;;  %v325_v23 = vshll.u32 %v3975_v12, 16  ;;  %v311_v26 = vor.u32 %v310_v15, %v306_v10  ;;  %v1864_v30 = vrot.slane %v3926_v39, 1 }
  0x2f   :  { %v322_v22 = vrot.slane %v320_v13, 1  ;;  %v1865_v32 = vrot.slane %v3939_v48, 1  ;;  %v1734_v33 = vshrl.u32 %v3982_v16, 16  ;;  %v451_v34 = vsel %vm421_vm0, %v449_v17, %v450_v18  ;;  %v4063_v11 = vld [vmem:[%s5161_s0 + $0x174] sm:$0xff]  }
  0x30   :  { %v316_v38 = vsel %vm196_vm1, %v311_v26, %v315_v21  ;;  %v327_v40 = vrot.slane %v325_v23, 1  ;;  %v1741_v42 = vshll.u32 %v3645_v27, 16  ;;  %v1867_v43 = vrot.slane %v3982_v16, 1 }
  0x31   :  { %1897 = vrot.lane.b32.xlu1 %v1857_v25, %s3699_s22  ;;  %v448_v25 = vsel %vm421_vm0, %v446_v5, %v447_v8  ;;  %v1868_v44 = vrot.slane %v3645_v27, 1  ;;  %v1753_v45 = vshll.u32 %v4004_v31, 16  ;;  %v1746_v47 = vshrl.u32 %v3993_v24, 16  ;;  %v3653_v5 = vld [vmem:[%s5161_s0 + $0x170] ss:$0 sps:$4 sm:$0x11]  }
  0x32   :  { %1817 = vrot.lane.b32.xlu0 %v1696_v29, %s3700_s6  ;;  %v1736_v29 = vshll.u32 %v3982_v16, 16  ;;  %v332_v51 = vshll.u32 %v4015_v37, 16  ;;  %v452_v58 = vrot.slane %v3962_v0, 1  ;;  %v330_v59 = vshrl.u32 %v4015_v37, 16 }
  0x33   :  { %v1755_v57 = vrot.slane %v1753_v45, 1  ;;  %v1869_v60 = vsel %vm421_vm0, %v1867_v43, %v1868_v44  ;;  %v337_v63 = vshll.u32 %v3649_v49, 16  ;;  %v453_v2 = vrot.slane %v3975_v12, 1  ;;  %v4105_v45 = vld [vmem:[%s5161_s0 + $0xa8] sm:$0xff]  }
  0x34   :  { %v1738_v41 = vrot.slane %v1736_v29, 1  ;;  %v344_v3 = vshll.u32 %v4032_v54, 16  ;;  %v349_v7 = vshll.u32 %v4037_v55, 16  ;;  %v456_v8 = vrot.slane %v3649_v49, 1 }
  0x35   :  { %1819 = vrot.lane.b32.xlu1 %v1708_v35, %s3700_s6  ;;  %v323_v35 = vor.u32 %v322_v22, %v318_v19  ;;  %v1870_v9 = vrot.slane %v3993_v24, 1  ;;  %v1871_v10 = vrot.slane %v4004_v31, 1  ;;  %v342_v15 = vshrl.u32 %v4032_v54, 16  ;;  %v4081_v31 = vld [vmem:[%s5161_s0 + $0x17c] ss:$0 sps:$4 sm:$0x11]  }
  0x36   :  { %482 = vrot.lane.b32.xlu0 %v442_v36, %s3699_s22  ;;  %v1748_v36 = vshll.u32 %v3993_v24, 16  ;;  %v1739_v50 = vor.u32 %v1738_v41, %v1734_v33  ;;  %v454_v17 = vsel %vm421_vm0, %v452_v58, %v453_v2  ;;  %v346_v18 = vrot.slane %v344_v3, 1 }
  0x37   :  { %v328_v52 = vsel %vm196_vm1, %v323_v35, %v327_v40  ;;  %v1760_v19 = vshll.u32 %v4050_v4, 16  ;;  %v1873_v21 = vrot.slane %v4050_v4, 1  ;;  %v1765_v22 = vshll.u32 %v3653_v5, 16  ;;  %v3657_v40 = vld [vmem:[%s5161_s0 + $0xa4] ss:$0 sps:$4 sm:$0x11]  }
  0x38   :  { %v1750_v48 = vrot.slane %v1748_v36, 1  ;;  %v458_v23 = vrot.slane %v4032_v54, 1  ;;  %v1772_v26 = vshll.u32 %v4063_v11, 16  ;;  %v459_v35 = vrot.slane %v4037_v55, 1  ;;  %v4088_v36 = vld [vmem:[%s5161_s0 + $0x9c] sm:$0xff]  }
  0x39   :  { %484 = vrot.lane.b32.xlu1 %v445_v46, %s3699_s22  ;;  %v1866_v46 = vsel %vm421_vm0, %v1864_v30, %v1865_v32  ;;  %v1758_v30 = vshrl.u32 %v4050_v4, 16  ;;  %v347_v32 = vor.u32 %v346_v18, %v342_v15  ;;  %v1762_v33 = vrot.slane %v1760_v19, 1 }
  0x3a   :  { %403 = vrot.lane.b32.xlu0 %v292_v53, %s3700_s6  ;;  %v1743_v53 = vrot.slane %v1741_v42, 1  ;;  %v1751_v61 = vor.u32 %v1750_v48, %v1746_v47  ;;  %v1774_v41 = vrot.slane %v1772_v26, 1  ;;  %v4097_v42 = vld [vmem:[%s5161_s0 + $0xb0] ss:$0 sps:$4 sm:$0x11]   ;;  %v1872_v43 = vsel %vm421_vm0, %v1870_v9, %v1871_v10  ;;  %v4165_v26 = vld [vmem:[%s5161_s0 + $0xc0] sm:$0xff]  }
  0x3b   :  { %v1777_v44 = vshll.u32 %v4081_v31, 16  ;;  %v1763_v48 = vor.u32 %v1762_v33, %v1758_v30  ;;  %v356_v49 = vshll.u32 %v4088_v36, 16  ;;  %v361_v58 = vshll.u32 %v3657_v40, 16  ;;  %v4139_v9 = vld [vmem:[%s5161_s0 + $0x18c] sm:$0xff]   ;;  %v4180_v30 = vld [vmem:[%s5161_s0 + $0xb4] sm:$0xff]  }
  0x3c   :  { %v1756_v12 = vsel %vm196_vm1, %v1751_v61, %v1755_v57  ;;  %v354_v57 = vshrl.u32 %v4088_v36, 16  ;;  %v1876_v61 = vrot.slane %v4063_v11, 1  ;;  %v373_v3 = vshll.u32 %v4097_v42, 16 }
  0x3d   :  { %1899 = vrot.lane.b32.xlu1 %v1860_v62, %s3699_s22  ;;  %v334_v62 = vrot.slane %v332_v51, 1  ;;  %v4115_v51 = vld [vmem:[%s5161_s0 + $0x180] sm:$0xff]   ;;  %v358_v2 = vrot.slane %v356_v49, 1  ;;  %v363_v10 = vrot.slane %v361_v58, 1  ;;  %v460_v18 = vsel %vm421_vm0, %v458_v23, %v459_v35 }
  0x3e   :  { %405 = vrot.lane.b32.xlu0 %v304_v1, %s3700_s6  ;;  %v1744_v1 = vsel %vm196_vm1, %v1739_v50, %v1743_v53  ;;  %v461_v53 = vrot.slane %v4088_v36, 1  ;;  %v1782_v15 = vshrl.u32 %v4115_v51, 16  ;;  %v4172_v23 = vld [vmem:[%s5162_s1] sm:$0x3f]   ;;  %v1794_v33 = vshrl.u32 %v4139_v9, 16 }
  0x3f   :  { %v335_v13 = vor.u32 %v334_v62, %v330_v59  ;;  %v368_v62 = vshll.u32 %v4105_v45, 16  ;;  %v359_v19 = vor.u32 %v358_v2, %v354_v57  ;;  %v465_v58 = vrot.slane %v4097_v42, 1 }
  0x40   :  { %vm535_vm4 = vcmask 64512   ;;  %vm609_vm5 = vcmask 97280   ;;  %vm1354_vm6 = vcmask 1040384  }
  0x41   :  { %1901 = vrot.lane.b32.xlu1 %v1863_v6, %s3699_s22  ;;  %v455_v6 = vrot.slane %v4015_v37, 1 }
  0x42   :  { %1821 = vrot.lane.b32.xlu0 %v1720_v14, %s3700_s6  ;;  %v339_v14 = vrot.slane %v337_v63, 1 }
  0x43   :  { %v457_v27 = vsel %vm421_vm0, %v455_v6, %v456_v8  ;;  %v462_v6 = vrot.slane %v3657_v40, 1  ;;  %v366_v8 = vshrl.u32 %v4105_v45, 16 }
  0x44   :  { %v340_v29 = vsel %vm196_vm1, %v335_v13, %v339_v14  ;;  %v370_v14 = vrot.slane %v368_v62, 1 }
  0x45   :  { %1823 = vrot.lane.b32.xlu1 %v1732_v20, %s3700_s6  ;;  %v351_v20 = vrot.slane %v349_v7, 1  ;;  %v1877_v7 = vrot.slane %v4081_v31, 1  ;;  %v364_v31 = vsel %vm196_vm1, %v359_v19, %v363_v10 }
  0x46   :  { %486 = vrot.lane.b32.xlu0 %v448_v25, %s3699_s22  ;;  %v1874_v25 = vrot.slane %v3653_v5, 1  ;;  %v1784_v5 = vshll.u32 %v4115_v51, 16 }
  0x47   :  { %v352_v47 = vsel %vm196_vm1, %v347_v32, %v351_v20  ;;  %v375_v20 = vrot.slane %v373_v3, 1  ;;  %v371_v32 = vor.u32 %v370_v14, %v366_v8  ;;  %v1878_v40 = vsel %vm421_vm0, %v1876_v61, %v1877_v7  ;;  %v4227_v14 = vld [vmem:[%s5161_s0 + $0xd8] sm:$0xff]  }
  0x48   :  { %v1875_v50 = vsel %vm421_vm0, %v1873_v21, %v1874_v25  ;;  %v1786_v21 = vrot.slane %v1784_v5, 1  ;;  %v1796_v25 = vshll.u32 %v4139_v9, 16  ;;  %v579_v61 = vshrl.u32 %v4165_v26, 16 }
  0x49   :  { %488 = vrot.lane.b32.xlu1 %v451_v34, %s3699_s22  ;;  %v1770_v34 = vshrl.u32 %v4063_v11, 16  ;;  %v378_v3 = vshrl.u32 %v4180_v30, 16 }
  0x4a   :  { %407 = vrot.lane.b32.xlu0 %v316_v38, %s3700_s6  ;;  %v1767_v38 = vrot.slane %v1765_v22, 1  ;;  %v4159_v22 = vld [vmem:[%s5161_s0 + $0x194] ss:$0 sps:$4 sm:$0x11]  }
  0x4b   :  { %v1775_v55 = vor.u32 %v1774_v41, %v1770_v34  ;;  %v1798_v34 = vrot.slane %v1796_v25, 1  ;;  %v1801_v35 = vshll.u32 %v4159_v22, 16  ;;  %v1879_v41 = vrot.slane %v4115_v51, 1 }
  0x4d   :  { %1903 = vrot.lane.b32.xlu1 %v1866_v46, %s3699_s22  ;;  %v3670_v46 = vld [vmem:[%s5162_s1 + $0x8] sm:$0x3f]   ;;  %v1803_v57 = vrot.slane %v1801_v35, 1  ;;  %v4244_v35 = vld [vmem:[%s5161_s0] sm:$0xff]  }
  0x4e   :  { %409 = vrot.lane.b32.xlu0 %v328_v52, %s3700_s6  ;;  %v3671_v52 = vld [vmem:[%s5162_s1 + $0x8] sm:$0x3f]   ;;  %3527 = vmatprep.subr.msk.bf16.mxu1 %vm642_vm2, %v3670_v46  ;;  %v2054_v59 = vsel %vm642_vm2, %v3670_v46, 0  ;;  %v4200_v46 = vld [vmem:[%s5161_s0 + $0x198] sm:$0xff]  }
  0x4f   :  { %3295 = vmatpush3.bf16.msra.mxu1 %v2054_v59  ;;  %v644_v63 = vsel %vm642_vm2, %v3671_v52, 0  ;;  %3524 = vmatprep.subr.msk.bf16.mxu0 %vm642_vm2, %v3671_v52  ;;  %v3667_v52 = vld [vmem:[%s5161_s0 + $0xbc] ss:$0 sps:$4 sm:$0x11]   ;;  %v1992_v10 = vshrl.u32 %v4200_v46, 16 }
  0x50   :  { %3193 = vmatpush3.bf16.msra.mxu0 %v644_v63  ;;  %3528 = vmatprep.subr.msk.bf16.mxu1 %vm642_vm2, %v4172_v23  ;;  %v3669_v63 = vld [vmem:[%s5161_s0 + $0x1a0] ss:$0 sps:$4 sm:$0x11]   ;;  %v385_v5 = vshll.u32 %v3667_v52, 16 }
  0x51   :  { %1905 = vrot.lane.b32.xlu1 %v1869_v60, %s3699_s22  ;;  %v1779_v60 = vrot.slane %v1777_v44, 1  ;;  %v581_v44 = vshll.u32 %v4165_v26, 16 }
  0x52   :  { %1825 = vrot.lane.b32.xlu0 %v1744_v1, %s3700_s6  ;;  %v1768_v1 = vsel %vm196_vm1, %v1763_v48, %v1767_v38  ;;  %v4191_v38 = vld [vmem:[%s5161_s0 + $0xc8] ss:$0 sps:$4 sm:$0x11]   ;;  %v1787_v48 = vor.u32 %v1786_v21, %v1782_v15  ;;  %v387_v19 = vrot.slane %v385_v5, 1 }
  0x53   :  { %v1780_v13 = vsel %vm196_vm1, %v1775_v55, %v1779_v60  ;;  %v1799_v55 = vor.u32 %v1798_v34, %v1794_v33  ;;  %v586_v59 = vshll.u32 %v4191_v38, 16  ;;  %v583_v62 = vrot.slane %v581_v44, 1 }
  0x54   :  { %v467_v33 = vrot.slane %v4180_v30, 1  ;;  %v468_v34 = vrot.slane %v3667_v52, 1  ;;  %v1883_v44 = vrot.slane %v4159_v22, 1  ;;  %v4263_v22 = vld [vmem:[%s5161_s0 + $0x8] ss:$0 sps:$4 sm:$0x11]  }
  0x55   :  { %1827 = vrot.lane.b32.xlu1 %v1756_v12, %s3700_s6  ;;  %v3661_v12 = vld [vmem:[%s5161_s0 + $0x188] ss:$0 sps:$4 sm:$0x11]   ;;  %v588_v7 = vrot.slane %v586_v59, 1  ;;  %v584_v8 = vor.u32 %v583_v62, %v579_v61  ;;  %v3684_v59 = vld [vmem:[%s5161_s0 + $0xc] sm:$0xff]  }
  0x56   :  { %490 = vrot.lane.b32.xlu0 %v454_v17, %s3699_s22  ;;  %v4151_v17 = vld [vmem:[%s5162_s1] sm:$0x3f]  }
  0x57   :  { %3525 = vmatprep.subr.msk.bf16.mxu0 %vm642_vm2, %v4151_v17 }
  0x59   :  { %492 = vrot.lane.b32.xlu1 %v457_v27, %s3699_s22  ;;  %v463_v27 = vsel %vm421_vm0, %v461_v53, %v462_v6  ;;  %v464_v53 = vrot.slane %v4105_v45, 1  ;;  %v1804_v6 = vsel %vm196_vm1, %v1799_v55, %v1803_v57  ;;  %v469_v55 = vsel %vm421_vm0, %v467_v33, %v468_v34  ;;  %v3680_v33 = vld [vmem:[%s5162_s1 + $0x10] sm:$0x3f]  }
  0x5a   :  { %411 = vrot.lane.b32.xlu0 %v340_v29, %s3700_s6  ;;  %v1789_v29 = vshll.u32 %v3661_v12, 16  ;;  %v200_v57 = vshll.u32 %v4244_v35, 16 }
  0x5b   :  { %v466_v15 = vsel %vm421_vm0, %v464_v53, %v465_v58 }
  0x5c   :  { %v1791_v49 = vrot.slane %v1789_v29, 1  ;;  %v1616_v29 = vshll.u32 %v4227_v14, 16 }
  0x5d   :  { %1907 = vrot.lane.b32.xlu1 %v1872_v43, %s3699_s22  ;;  %v1880_v43 = vrot.slane %v3661_v12, 1 }
  0x5e   :  { %413 = vrot.lane.b32.xlu0 %v352_v47, %s3700_s6  ;;  %v376_v47 = vsel %vm196_vm1, %v371_v32, %v375_v20  ;;  %v1792_v2 = vsel %vm196_vm1, %v1787_v48, %v1791_v49  ;;  %v589_v20 = vsel %vm196_vm1, %v584_v8, %v588_v7  ;;  %v1614_v48 = vshrl.u32 %v4227_v14, 16 }
  0x5f   :  { %v1881_v60 = vsel %vm421_vm0, %v1879_v41, %v1880_v43  ;;  %v2006_v41 = vrot.slane %v3669_v63, 1  ;;  %v1882_v43 = vrot.slane %v4139_v9, 1  ;;  %v1618_v49 = vrot.slane %v1616_v29, 1 }
  0x60   :  { %v593_v7 = vrot.slane %v4191_v38, 1  ;;  %v198_v8 = vshrl.u32 %v4244_v35, 16  ;;  %v1837_v38 = vrot.slane %v4227_v14, 1 }
  0x61   :  { %1909 = vrot.lane.b32.xlu1 %v1875_v50, %s3699_s22  ;;  %v380_v50 = vshll.u32 %v4180_v30, 16  ;;  %v1884_v62 = vsel %vm421_vm0, %v1882_v43, %v1883_v44  ;;  %v4320_v44 = vld [vmem:[%s5161_s0 + $0xd4] ss:$0 sps:$4 sm:$0x11]  }
  0x62   :  { %1829 = vrot.lane.b32.xlu0 %v1768_v1, %s3700_s6  ;;  %v1994_v1 = vshll.u32 %v4200_v46, 16 }
  0x63   :  { %v382_v42 = vrot.slane %v380_v50, 1  ;;  %v4257_v50 = vld [vmem:[%s5161_s0 + $0x1a4] sm:$0xff]  }
  0x64   :  { %v1996_v12 = vrot.slane %v1994_v1, 1  ;;  %v2399_v5 = vshll.u32 %v4257_v50, 16 }
  0x65   :  { %1831 = vrot.lane.b32.xlu1 %v1780_v13, %s3700_s6  ;;  %v1999_v13 = vshll.u32 %v3669_v63, 16  ;;  %v592_v63 = vrot.slane %v4165_v26, 1 }
  0x66   :  { %494 = vrot.lane.b32.xlu0 %v460_v18, %s3699_s22  ;;  %v383_v18 = vor.u32 %v382_v42, %v378_v3  ;;  %v1997_v21 = vor.u32 %v1996_v12, %v1992_v10  ;;  %v4281_v42 = vld [vmem:[%s5161_s0 + $0x1ac] ss:$0 sps:$4 sm:$0x11]   ;;  %v202_v10 = vrot.slane %v200_v57, 1  ;;  %v205_v12 = vshll.u32 %v4263_v22, 16 }
  0x67   :  { %v2001_v25 = vrot.slane %v1999_v13, 1  ;;  %v4292_v13 = vld [vmem:[%s5161_s0 + $0xcc] sm:$0xff]  }
  0x68   :  { %v388_v32 = vsel %vm196_vm1, %v383_v18, %v387_v19  ;;  %v3685_v18 = vld [vmem:[%s5161_s0 + $0xe4] sm:$0xff]   ;;  %v207_v43 = vrot.slane %v205_v12, 1  ;;  %v815_v12 = vsel %vm642_vm2, %v4151_v17, 0 }
  0x69   :  { %496 = vrot.lane.b32.xlu1 %v463_v27, %s3699_s22  ;;  %v4236_v27 = vld [vmem:[%s5161_s0 + $0xe0] ss:$0 sps:$4 sm:$0x11]  }
  0x6a   :  { %415 = vrot.lane.b32.xlu0 %v364_v31, %s3700_s6  ;;  %v1621_v52 = vshll.u32 %v4236_v27, 16 }
  0x6c   :  { %v1623_v3 = vrot.slane %v1621_v52, 1  ;;  %v4327_v52 = vsel %vm642_vm2, %v3680_v33, 0 }
  0x6d   :  { %1911 = vrot.lane.b32.xlu1 %v1878_v40, %s3699_s22  ;;  %v2005_v40 = vrot.slane %v4200_v46, 1 }
  0x6e   :  { %417 = vrot.lane.b32.xlu0 %v376_v47, %s3700_s6  ;;  %v2002_v47 = vsel %vm196_vm1, %v1997_v21, %v2001_v25  ;;  %v2397_v21 = vshrl.u32 %v4257_v50, 16 }
  0x6f   :  { %v2007_v61 = vsel %vm421_vm0, %v2005_v40, %v2006_v41  ;;  %v594_v40 = vsel %vm421_vm0, %v592_v63, %v593_v7  ;;  %v203_v41 = vor.u32 %v202_v10, %v198_v8  ;;  %v3687_v8 = vld [vmem:[%s5161_s0 + $0x18] sm:$0xff]  }
  0x71   :  { %1913 = vrot.lane.b32.xlu1 %v1881_v60, %s3699_s22 }
  0x72   :  { %1833 = vrot.lane.b32.xlu0 %v1792_v2, %s3700_s6  ;;  %v1619_v2 = vor.u32 %v1618_v49, %v1614_v48 }
  0x74   :  { %v1624_v29 = vsel %vm196_vm1, %v1619_v2, %v1623_v3  ;;  %v208_v3 = vsel %vm196_vm1, %v203_v41, %v207_v43  ;;  %v1000_v43 = vrot.slane %v4292_v13, 1 }
  0x75   :  { %1835 = vrot.lane.b32.xlu1 %v1804_v6, %s3700_s6 }
  0x76   :  { %498 = vrot.lane.b32.xlu0 %v466_v15, %s3699_s22 }
  0x77   :  { %v473_v31 = vpop.permute.xlu1 %472 }
  0x79   :  { %590 = vrot.lane.b32.xlu1 %v589_v20, %s3700_s6  ;;  %v1838_v20 = vrot.slane %v4236_v27, 1  ;;  %v3681_v27 = vld [vmem:[%s5162_s1 + $0x10] sm:$0x3f]  }
  0x7a   :  { %419 = vrot.lane.b32.xlu0 %v388_v32, %s3700_s6  ;;  %v2404_v32 = vshll.u32 %v4281_v42, 16  ;;  %v4324_v49 = vsel %vm642_vm2, %v3681_v27, 0 }
  0x7b   :  { %v1888_v53 = vpop.permute.xlu1 %1887  ;;  %v1839_v57 = vsel %vm421_vm0, %v1837_v38, %v1838_v20 }
  0x7c   :  { %v392_v58 = vpop.permute.xlu0 %391  ;;  %v2406_v63 = vrot.slane %v2404_v32, 1 }
  0x7d   :  { %v506_v60 = vsel %vm502_vm3, %v3684_v59, %v392_v58  ;;  %2003 = vrot.lane.b32.xlu1 %v2002_v47, %s3700_s6  ;;  %v989_v47 = vshll.u32 %v4292_v13, 16  ;;  %v422_v58 = vrot.slane %v4244_v35, 1  ;;  %v2225_v59 = vsel %vm642_vm2, %v4172_v23, 0 }
  0x7e   :  { %500 = vrot.lane.b32.xlu0 %v469_v55, %s3699_s22  ;;  %v4276_v1 = vsel %vm535_vm4, %v506_v60, %v473_v31  ;;  %v2401_v31 = vrot.slane %v2399_v5, 1  ;;  %v987_v5 = vshrl.u32 %v4292_v13, 16  ;;  %v994_v23 = vshll.u32 %v4320_v44, 16 }
  0x7f   :  { %3194 = vmatprep.mubr.msk.bf16.mxu0 %vm609_vm5, %v4276_v1  ;;  %v394_v6 = vpop.permute.xlu1 %393  ;;  %v991_v7 = vrot.slane %v989_v47, 1  ;;  %v1001_v47 = vrot.slane %v4320_v44, 1 }
  0x80   :  { %v1808_v15 = vpop.permute.xlu0 %1807  ;;  %v508_v10 = vsel %vm502_vm3, %v3687_v8, %v394_v6  ;;  %v2410_v6 = vrot.slane %v4257_v50, 1  ;;  %v3692_v8 = vld [vmem:[%s5161_s0 + $0x3c] sm:$0xff]  }
  0x81   :  { %v1920_v19 = vsel %vm502_vm3, %v3685_v18, %v1808_v15  ;;  %2008 = vrot.lane.b32.xlu1 %v2007_v61, %s3699_s22  ;;  %v423_v61 = vrot.slane %v4263_v22, 1  ;;  %v992_v20 = vor.u32 %v991_v7, %v987_v5 }
  0x82   :  { %1915 = vrot.lane.b32.xlu0 %v1884_v62, %s3699_s22  ;;  %v4304_v25 = vsel %vm535_vm4, %v1920_v19, %v1888_v53  ;;  %v3686_v53 = vld [vmem:[%s5161_s0 + $0xf0] sm:$0xff]   ;;  %v2402_v62 = vor.u32 %v2401_v31, %v2397_v21  ;;  %v2411_v19 = vrot.slane %v4281_v42, 1  ;;  %v996_v21 = vrot.slane %v994_v23, 1  ;;  %v3688_v31 = vld [vmem:[%s5161_s0 + $0x24] sm:$0xff]  }
  0x83   :  { %3296 = vmatprep.mubr.msk.bf16.mxu1 %vm609_vm5, %v4304_v25  ;;  %v1890_v34 = vpop.permute.xlu1 %1889  ;;  %v424_v38 = vsel %vm421_vm0, %v422_v58, %v423_v61 }
  0x84   :  { %v1810_v48 = vpop.permute.xlu0 %1809  ;;  %v2407_v18 = vsel %vm196_vm1, %v2402_v62, %v2406_v63  ;;  %v997_v41 = vsel %vm196_vm1, %v992_v20, %v996_v21  ;;  %v3691_v63 = vld [vmem:[%s5161_s0 + $0x30] sm:$0xff]   ;;  %v3694_v21 = vld [vmem:[%s5161_s0 + $0x120] sm:$0xff]  }
  0x85   :  { %v1922_v55 = vsel %vm502_vm3, %v3686_v53, %v1810_v48  ;;  %1805 = vrot.lane.b32.xlu1 %v1624_v29, %s3700_s6 }
  0x86   :  { %595 = vrot.lane.b32.xlu0 %v594_v40, %s3699_s22  ;;  %v4340_v60 = vsel %vm535_vm4, %v1922_v55, %v1890_v34  ;;  %v3689_v34 = vld [vmem:[%s5161_s0 + $0xfc] sm:$0xff]  }
  0x87   :  { %3297 = vmatmul.mubr.msk.bf16.vlgmr.msra.gmra.mrb[0].mxu1 %vm609_vm5, %v4340_v60  ;;  %v1812_v2 = vpop.permute.xlu1 %1811 }
  0x88   :  { %v475_v22 = vpop.permute.xlu0 %474  ;;  %3329 = vmatpush3.bf16.msra.mxu1 %v2225_v59  ;;  %v3690_v59 = vld [vmem:[%s5161_s0 + $0x108] sm:$0xff]  }
  0x89   :  { %v4355_v15 = vsel %vm535_vm4, %v508_v10, %v475_v22  ;;  %1885 = vrot.lane.b32.xlu1 %v1839_v57, %s3699_s22  ;;  %3529 = vmatprep.subr.msk.bf16.mxu1 %vm642_vm2, %v3681_v27  ;;  %v2412_v27 = vsel %vm421_vm0, %v2410_v6, %v2411_v19  ;;  %v1002_v57 = vsel %vm421_vm0, %v1000_v43, %v1001_v47  ;;  %v3696_v47 = vld [vmem:[%s5161_s0 + $0x54] sm:$0xff]  }
  0x8a   :  { %3195 = vmatmul.mubr.msk.bf16.vlgmr.msra.gmra.mrb[0].mxu0 %vm609_vm5, %v4355_v15  ;;  %389 = vrot.lane.b32.xlu0 %v208_v3, %s3700_s6 }
  0x8b   :  { %v477_v17 = vpop.permute.xlu1 %476  ;;  %3227 = vmatpush3.bf16.msra.mxu0 %v815_v12  ;;  %v3693_v12 = vld [vmem:[%s5161_s0 + $0x114] sm:$0xff]  }
  0x8c   :  { %v396_v29 = vpop.permute.xlu0 %395  ;;  %3526 = vmatprep.subr.msk.bf16.mxu0 %vm642_vm2, %v3680_v33  ;;  %v1924_v33 = vsel %vm502_vm3, %v3689_v34, %v1812_v2 }
  0x8d   :  { %v510_v32 = vsel %vm502_vm3, %v3688_v31, %v396_v29  ;;  %2408 = vrot.lane.b32.xlu1 %v2407_v18, %s3700_s6 }
  0x8e   :  { %470 = vrot.lane.b32.xlu0 %v424_v38, %s3699_s22  ;;  %v4374_v42 = vsel %vm535_vm4, %v510_v32, %v477_v17 }
  0x8f   :  { %3198 = vmatprep.mubr.msk.bf16.mxu0 %vm609_vm5, %v4374_v42  ;;  %v1892_v40 = vpop.permute.xlu1 %1891 }
  0x90   :  { %v4387_v48 = vsel %vm535_vm4, %v1924_v33, %v1892_v40  ;;  %v398_v53 = vpop.permute.xlu0 %397 }
  0x91   :  { %3300 = vmatprep.mubr.msk.bf16.mxu1 %vm609_vm5, %v4387_v48  ;;  %2413 = vrot.lane.b32.xlu1 %v2412_v27, %s3699_s22  ;;  %v512_v2 = vsel %vm502_vm3, %v3691_v63, %v398_v53  ;;  %v3695_v27 = vld [vmem:[%s5161_s0 + $0x48] sm:$0xff]  }
  0x92   :  { %998 = vrot.lane.b32.xlu0 %v997_v41, %s3700_s6 }
  0x93   :  { %v1894_v55 = vpop.permute.xlu1 %1893 }
  0x94   :  { %v1814_v58 = vpop.permute.xlu0 %1813 }
  0x95   :  { %v1926_v44 = vsel %vm502_vm3, %v3690_v59, %v1814_v58 }
  0x96   :  { %v4399_v61 = vsel %vm535_vm4, %v1926_v44, %v1894_v55  ;;  %1003 = vrot.lane.b32.xlu0 %v1002_v57, %s3699_s22  ;;  %v3697_v57 = vld [vmem:[%s5161_s0 + $0x12c] sm:$0xff]  }
  0x97   :  { %3301 = vmatmul.mubr.msk.bf16.gmra.mrb[4].mxu1 %vm609_vm5, %v4399_v61  ;;  %v1816_v62 = vpop.permute.xlu1 %1815 }
  0x98   :  { %v479_v3 = vpop.permute.xlu0 %478  ;;  %v1928_v18 = vsel %vm502_vm3, %v3693_v12, %v1816_v62 }
  0x99   :  { %v4409_v5 = vsel %vm535_vm4, %v512_v2, %v479_v3 }
  0x9a   :  { %3199 = vmatmul.mubr.msk.bf16.gmra.mrb[4].mxu0 %vm609_vm5, %v4409_v5 }
  0x9b   :  { %v481_v7 = vpop.permute.xlu1 %480 }
  0x9c   :  { %v400_v23 = vpop.permute.xlu0 %399 }
  0x9d   :  { %v514_v10 = vsel %vm502_vm3, %v3692_v8, %v400_v23  ;;  %v3698_v8 = vld [vmem:[%s5161_s0 + $0x60] sm:$0xff]  }
  0x9e   :  { %v4418_v22 = vsel %vm535_vm4, %v514_v10, %v481_v7 }
  0x9f   :  { %3202 = vmatprep.mubr.msk.bf16.mxu0 %vm609_vm5, %v4418_v22  ;;  %v1896_v6 = vpop.permute.xlu1 %1895 }
  0xa0   :  { %v4427_v19 = vsel %vm535_vm4, %v1928_v18, %v1896_v6  ;;  %v402_v17 = vpop.permute.xlu0 %401 }
  0xa1   :  { %3304 = vmatprep.mubr.msk.bf16.mxu1 %vm609_vm5, %v4427_v19  ;;  %v516_v34 = vsel %vm502_vm3, %v3695_v27, %v402_v17 }
  0xa3   :  { %v1898_v38 = vpop.permute.xlu1 %1897 }
  0xa4   :  { %v1818_v20 = vpop.permute.xlu0 %1817 }
  0xa5   :  { %v1930_v29 = vsel %vm502_vm3, %v3694_v21, %v1818_v20 }
  0xa6   :  { %v4436_v31 = vsel %vm535_vm4, %v1930_v29, %v1898_v38 }
  0xa7   :  { %3305 = vmatmul.mubr.msk.bf16.gmra.mrb[8].mxu1 %vm609_vm5, %v4436_v31  ;;  %v1820_v32 = vpop.permute.xlu1 %1819 }
  0xa8   :  { %v483_v33 = vpop.permute.xlu0 %482  ;;  %v1932_v58 = vsel %vm502_vm3, %v3697_v57, %v1820_v32 }
  0xa9   :  { %v4445_v40 = vsel %vm535_vm4, %v516_v34, %v483_v33 }
  0xaa   :  { %3203 = vmatmul.mubr.msk.bf16.gmra.mrb[8].mxu0 %vm609_vm5, %v4445_v40 }
  0xab   :  { %v485_v41 = vpop.permute.xlu1 %484 }
  0xac   :  { %v404_v43 = vpop.permute.xlu0 %403 }
  0xad   :  { %v518_v53 = vsel %vm502_vm3, %v3696_v47, %v404_v43 }
  0xae   :  { %v4454_v55 = vsel %vm535_vm4, %v518_v53, %v485_v41 }
  0xaf   :  { %3206 = vmatprep.mubr.msk.bf16.mxu0 %vm609_vm5, %v4454_v55  ;;  %v1900_v59 = vpop.permute.xlu1 %1899 }
  0xb0   :  { %v4463_v44 = vsel %vm535_vm4, %v1932_v58, %v1900_v59  ;;  %v406_v62 = vpop.permute.xlu0 %405 }
  0xb1   :  { %3308 = vmatprep.mubr.msk.bf16.mxu1 %vm609_vm5, %v4463_v44  ;;  %v520_v10 = vsel %vm502_vm3, %v3698_v8, %v406_v62 }
  0xb3   :  { %v1902_v63 = vpop.permute.xlu1 %1901 }
  0xb4   :  { %v1822_v2 = vpop.permute.xlu0 %1821 }
  0xb5   :  { %v1934_v3 = vsel %vm502_vm3, %v3913_v28, %v1822_v2 }
  0xb6   :  { %v4470_v7 = vsel %vm535_vm4, %v1934_v3, %v1902_v63 }
  0xb7   :  { %3309 = vmatmul.mubr.msk.bf16.gmra.mrb[12].mxu1 %vm609_vm5, %v4470_v7  ;;  %v1824_v23 = vpop.permute.xlu1 %1823 }
  0xb8   :  { %v487_v12 = vpop.permute.xlu0 %486  ;;  %v1936_v20 = vsel %vm502_vm3, %v3926_v39, %v1824_v23 }
  0xb9   :  { %v4479_v18 = vsel %vm535_vm4, %v520_v10, %v487_v12 }
  0xba   :  { %3207 = vmatmul.mubr.msk.bf16.gmra.mrb[12].mxu0 %vm609_vm5, %v4479_v18 }
  0xbb   :  { %v489_v28 = vpop.permute.xlu1 %488 }
  0xbc   :  { %v408_v6 = vpop.permute.xlu0 %407 }
  0xbd   :  { %v522_v17 = vsel %vm502_vm3, %v3948_v56, %v408_v6 }
  0xbe   :  { %v4486_v38 = vsel %vm535_vm4, %v522_v17, %v489_v28 }
  0xbf   :  { %3210 = vmatprep.mubr.msk.bf16.mxu0 %vm609_vm5, %v4486_v38  ;;  %v1904_v21 = vpop.permute.xlu1 %1903 }
  0xc0   :  { %v4493_v29 = vsel %vm535_vm4, %v1936_v20, %v1904_v21  ;;  %v410_v32 = vpop.permute.xlu0 %409 }
  0xc1   :  { %3312 = vmatprep.mubr.msk.bf16.mxu1 %vm609_vm5, %v4493_v29  ;;  %v524_v41 = vsel %vm502_vm3, %v3962_v0, %v410_v32 }
  0xc3   :  { %v1906_v27 = vpop.permute.xlu1 %1905 }
  0xc4   :  { %v1826_v34 = vpop.permute.xlu0 %1825 }
  0xc5   :  { %v1938_v56 = vsel %vm502_vm3, %v3982_v16, %v1826_v34 }
  0xc6   :  { %v4500_v33 = vsel %vm535_vm4, %v1938_v56, %v1906_v27 }
  0xc7   :  { %3313 = vmatmul.mubr.msk.bf16.gmra.mrb[16].mxu1 %vm609_vm5, %v4500_v33  ;;  %v1828_v39 = vpop.permute.xlu1 %1827 }
  0xc8   :  { %v491_v43 = vpop.permute.xlu0 %490  ;;  %v1940_v59 = vsel %vm502_vm3, %v3993_v24, %v1828_v39 }
  0xc9   :  { %v4507_v47 = vsel %vm535_vm4, %v524_v41, %v491_v43 }
  0xca   :  { %3211 = vmatmul.mubr.msk.bf16.gmra.mrb[16].mxu0 %vm609_vm5, %v4507_v47 }
  0xcb   :  { %v493_v53 = vpop.permute.xlu1 %492 }
  0xcc   :  { %v412_v57 = vpop.permute.xlu0 %411 }
  0xcd   :  { %v526_v16 = vsel %vm502_vm3, %v4015_v37, %v412_v57 }
  0xce   :  { %v4514_v58 = vsel %vm535_vm4, %v526_v16, %v493_v53 }
  0xcf   :  { %3214 = vmatprep.mubr.msk.bf16.mxu0 %vm609_vm5, %v4514_v58  ;;  %v1908_v0 = vpop.permute.xlu1 %1907 }
  0xd0   :  { %v4521_v62 = vsel %vm535_vm4, %v1940_v59, %v1908_v0  ;;  %v414_v63 = vpop.permute.xlu0 %413 }
  0xd1   :  { %3316 = vmatprep.mubr.msk.bf16.mxu1 %vm609_vm5, %v4521_v62  ;;  %v528_v8 = vsel %vm502_vm3, %v4032_v54, %v414_v63 }
  0xd3   :  { %v1910_v2 = vpop.permute.xlu1 %1909 }
  0xd4   :  { %v1830_v3 = vpop.permute.xlu0 %1829 }
  0xd5   :  { %v1942_v37 = vsel %vm502_vm3, %v4050_v4, %v1830_v3 }
  0xd6   :  { %v4528_v23 = vsel %vm535_vm4, %v1942_v37, %v1910_v2 }
  0xd7   :  { %3317 = vmatmul.mubr.msk.bf16.gmra.mrb[20].mxu1 %vm609_vm5, %v4528_v23  ;;  %v1832_v24 = vpop.permute.xlu1 %1831 }
  0xd8   :  { %v495_v10 = vpop.permute.xlu0 %494  ;;  %v1944_v20 = vsel %vm502_vm3, %v4063_v11, %v1832_v24 }
  0xd9   :  { %v4535_v12 = vsel %vm535_vm4, %v528_v8, %v495_v10 }
  0xda   :  { %3215 = vmatmul.mubr.msk.bf16.gmra.mrb[20].mxu0 %vm609_vm5, %v4535_v12 }
  0xdb   :  { %v497_v28 = vpop.permute.xlu1 %496 }
  0xdc   :  { %v416_v6 = vpop.permute.xlu0 %415 }
  0xdd   :  { %v530_v4 = vsel %vm502_vm3, %v4088_v36, %v416_v6 }
  0xde   :  { %v4542_v17 = vsel %vm535_vm4, %v530_v4, %v497_v28 }
  0xdf   :  { %3218 = vmatprep.mubr.msk.bf16.mxu0 %vm609_vm5, %v4542_v17  ;;  %v1912_v54 = vpop.permute.xlu1 %1911 }
  0xe0   :  { %v4549_v21 = vsel %vm535_vm4, %v1944_v20, %v1912_v54  ;;  %v418_v32 = vpop.permute.xlu0 %417 }
  0xe1   :  { %3320 = vmatprep.mubr.msk.bf16.mxu1 %vm609_vm5, %v4549_v21  ;;  %v532_v39 = vsel %vm502_vm3, %v4105_v45, %v418_v32 }
  0xe3   :  { %v1914_v27 = vpop.permute.xlu1 %1913 }
  0xe4   :  { %v1834_v34 = vpop.permute.xlu0 %1833 }
  0xe5   :  { %v1946_v36 = vsel %vm502_vm3, %v4115_v51, %v1834_v34 }
  0xe6   :  { %v4556_v56 = vsel %vm535_vm4, %v1946_v36, %v1914_v27 }
  0xe7   :  { %3321 = vmatmul.mubr.msk.bf16.gmra.mrb[24].mxu1 %vm609_vm5, %v4556_v56  ;;  %v1836_v11 = vpop.permute.xlu1 %1835 }
  0xe8   :  { %v499_v41 = vpop.permute.xlu0 %498  ;;  %v1948_v2 = vsel %vm502_vm3, %v4139_v9, %v1836_v11 }
  0xe9   :  { %v4563_v43 = vsel %vm535_vm4, %v532_v39, %v499_v41 }
  0xea   :  { %3219 = vmatmul.mubr.msk.bf16.gmra.mrb[24].mxu0 %vm609_vm5, %v4563_v43 }
  0xeb   :  { %v591_v53 = vpop.permute.xlu1 %590 }
  0xec   :  { %v420_v57 = vpop.permute.xlu0 %419  ;;  %v598_v24 = vsel %vm502_vm3, %v4165_v26, %v591_v53 }
  0xed   :  { %v534_v16 = vsel %vm502_vm3, %v4180_v30, %v420_v57 }
  0xef   :  { %v2004_v51 = vpop.permute.xlu1 %2003 }
  0xf0   :  { %v501_v59 = vpop.permute.xlu0 %500  ;;  %v2011_v0 = vsel %vm502_vm3, %v4200_v46, %v2004_v51 }
  0xf1   :  { %v4572_v63 = vsel %vm535_vm4, %v534_v16, %v501_v59 }
  0xf2   :  { %3222 = vmatprep.mubr.msk.bf16.mxu0 %vm609_vm5, %v4572_v63 }
  0xf3   :  { %v2009_v45 = vpop.permute.xlu1 %2008 }
  0xf4   :  { %v4579_v3 = vsel %vm535_vm4, %v2011_v0, %v2009_v45  ;;  %v1916_v37 = vpop.permute.xlu0 %1915 }
  0xf5   :  { %v4582_v30 = vsel %vm535_vm4, %v1948_v2, %v1916_v37 }
  0xf6   :  { %3324 = vmatprep.mubr.msk.bf16.mxu1 %vm609_vm5, %v4582_v30 }
  0xf7   :  { %3325 = vmatmul.mubr.msk.bf16.gmra.mrb[28].mxu1 %vm609_vm5, %v4579_v3  ;;  %v1806_v46 = vpop.permute.xlu1 %1805 }
  0xf8   :  { %v596_v8 = vpop.permute.xlu0 %595  ;;  %v1918_v9 = vsel %vm502_vm3, %v4227_v14, %v1806_v46 }
  0xf9   :  { %v4593_v10 = vsel %vm535_vm4, %v598_v24, %v596_v8 }
  0xfa   :  { %3223 = vmatmul.mubr.msk.bf16.gmra.mrb[28].mxu0 %vm609_vm5, %v4593_v10 }
  0xfb   :  { %v1886_v28 = vpop.permute.xlu1 %1885 }
  0xfc   :  { %v1950_v6 = vsel %vm535_vm4, %v1918_v9, %v1886_v28  ;;  %v390_v4 = vpop.permute.xlu0 %389 }
  0xfd   :  { %3330 = vmatprep.mubr.msk.bf16.mxu1 %vm609_vm5, %v1950_v6  ;;  %v504_v26 = vsel %vm502_vm3, %v4244_v35, %v390_v4 }
  0xff   :  { %3331 = vmatmul.mubr.msk.bf16.vlgmr.msra.gmra.mrb[0].mxu1 %vm609_vm5, %v4304_v25  ;;  %v2409_v35 = vpop.permute.xlu1 %2408 }
 0x100   :  { %3334 = vmatprep.mubr.msk.bf16.mxu1 %vm609_vm5, %v4340_v60  ;;  %v471_v14 = vpop.permute.xlu0 %470  ;;  %3363 = vmatpush3.bf16.msra.mxu1 %v4324_v49  ;;  %v2416_v25 = vsel %vm502_vm3, %v4257_v50, %v2409_v35 }
 0x101   :  { %v537_v20 = vsel %vm535_vm4, %v504_v26, %v471_v14 }
 0x102   :  { %3228 = vmatprep.mubr.msk.bf16.mxu0 %vm609_vm5, %v537_v20 }
 0x103   :  { %3229 = vmatmul.mubr.msk.bf16.vlgmr.msra.gmra.mrb[0].mxu0 %vm609_vm5, %v4276_v1  ;;  %v2414_v49 = vpop.permute.xlu1 %2413 }
 0x104   :  { %3261 = vmatpush3.bf16.msra.mxu0 %v4327_v52  ;;  %3232 = vmatprep.mubr.msk.bf16.mxu0 %vm609_vm5, %v4355_v15  ;;  %v999_v1 = vpop.permute.xlu0 %998  ;;  %v2418_v52 = vsel %vm535_vm4, %v2416_v25, %v2414_v49 }
 0x107   :  { %3335 = vmatmul.mubr.msk.bf16.gmra.mrb[4].mxu1 %vm609_vm5, %v4387_v48 }
 0x108   :  { %3338 = vmatprep.mubr.msk.bf16.mxu1 %vm609_vm5, %v4399_v61 }
 0x10b   :  { %3233 = vmatmul.mubr.msk.bf16.gmra.mrb[4].mxu0 %vm609_vm5, %v4374_v42 }
 0x10c   :  { %3236 = vmatprep.mubr.msk.bf16.mxu0 %vm609_vm5, %v4409_v5 }
 0x10f   :  { %3339 = vmatmul.mubr.msk.bf16.gmra.mrb[8].mxu1 %vm609_vm5, %v4427_v19 }
 0x110   :  { %3342 = vmatprep.mubr.msk.bf16.mxu1 %vm609_vm5, %v4436_v31 }
 0x113   :  { %3237 = vmatmul.mubr.msk.bf16.gmra.mrb[8].mxu0 %vm609_vm5, %v4418_v22 }
 0x114   :  { %3240 = vmatprep.mubr.msk.bf16.mxu0 %vm609_vm5, %v4445_v40 }
 0x117   :  { %3343 = vmatmul.mubr.msk.bf16.gmra.mrb[12].mxu1 %vm609_vm5, %v4463_v44 }
 0x118   :  { %3346 = vmatprep.mubr.msk.bf16.mxu1 %vm609_vm5, %v4470_v7 }
 0x11b   :  { %3241 = vmatmul.mubr.msk.bf16.gmra.mrb[12].mxu0 %vm609_vm5, %v4454_v55 }
 0x11c   :  { %3244 = vmatprep.mubr.msk.bf16.mxu0 %vm609_vm5, %v4479_v18 }
 0x11f   :  { %3347 = vmatmul.mubr.msk.bf16.gmra.mrb[16].mxu1 %vm609_vm5, %v4493_v29 }
 0x120   :  { %3350 = vmatprep.mubr.msk.bf16.mxu1 %vm609_vm5, %v4500_v33 }
 0x123   :  { %3245 = vmatmul.mubr.msk.bf16.gmra.mrb[16].mxu0 %vm609_vm5, %v4486_v38 }
 0x124   :  { %3248 = vmatprep.mubr.msk.bf16.mxu0 %vm609_vm5, %v4507_v47 }
 0x127   :  { %3351 = vmatmul.mubr.msk.bf16.gmra.mrb[20].mxu1 %vm609_vm5, %v4521_v62 }
 0x128   :  { %3354 = vmatprep.mubr.msk.bf16.mxu1 %vm609_vm5, %v4528_v23 }
 0x12b   :  { %3249 = vmatmul.mubr.msk.bf16.gmra.mrb[20].mxu0 %vm609_vm5, %v4514_v58 }
 0x12c   :  { %3252 = vmatprep.mubr.msk.bf16.mxu0 %vm609_vm5, %v4535_v12 }
 0x12f   :  { %3355 = vmatmul.mubr.msk.bf16.gmra.mrb[24].mxu1 %vm609_vm5, %v4549_v21 }
 0x130   :  { %3358 = vmatprep.mubr.msk.bf16.mxu1 %vm609_vm5, %v4556_v56 }
 0x133   :  { %3253 = vmatmul.mubr.msk.bf16.gmra.mrb[24].mxu0 %vm609_vm5, %v4542_v17 }
 0x134   :  { %3256 = vmatprep.mubr.msk.bf16.mxu0 %vm609_vm5, %v4563_v43 }
 0x137   :  { %3359 = vmatmul.mubr.msk.bf16.gmra.mrb[28].mxu1 %vm609_vm5, %v4582_v30 }
 0x138   :  { %3364 = vmatprep.mubr.msk.bf16.mxu1 %vm609_vm5, %v4340_v60  ;;  %v1006_v60 = vsel %vm502_vm3, %v4292_v13, %v999_v1 }
 0x13b   :  { %3257 = vmatmul.mubr.msk.bf16.gmra.mrb[28].mxu0 %vm609_vm5, %v4572_v63 }
 0x13c   :  { %3262 = vmatprep.mubr.msk.bf16.mxu0 %vm609_vm5, %v4355_v15  ;;  %v1004_v15 = vpop.permute.xlu0 %1003 }
 0x13f   :  { %3365 = vmatmul.mubr.msk.bf16.vlgmr.msra.gmra.mrb[0].mxu1 %vm609_vm5, %v4387_v48 }
 0x140   :  { %3368 = vmatprep.mubr.msk.bf16.mxu1 %vm609_vm5, %v4399_v61 }
 0x143   :  { %3263 = vmatmul.mubr.msk.bf16.vlgmr.msra.gmra.mrb[0].mxu0 %vm609_vm5, %v4374_v42  ;;  %v1008_v42 = vsel %vm535_vm4, %v1006_v60, %v1004_v15 }
 0x144   :  { %3266 = vmatprep.mubr.msk.bf16.mxu0 %vm609_vm5, %v4409_v5 }
 0x147   :  { %3369 = vmatmul.mubr.msk.bf16.gmra.mrb[4].mxu1 %vm609_vm5, %v4427_v19 }
 0x148   :  { %3372 = vmatprep.mubr.msk.bf16.mxu1 %vm609_vm5, %v4436_v31 }
 0x14b   :  { %3267 = vmatmul.mubr.msk.bf16.gmra.mrb[4].mxu0 %vm609_vm5, %v4418_v22 }
 0x14c   :  { %3270 = vmatprep.mubr.msk.bf16.mxu0 %vm609_vm5, %v4445_v40 }
 0x14f   :  { %3373 = vmatmul.mubr.msk.bf16.gmra.mrb[8].mxu1 %vm609_vm5, %v4463_v44 }
 0x150   :  { %3376 = vmatprep.mubr.msk.bf16.mxu1 %vm609_vm5, %v4470_v7 }
 0x153   :  { %3271 = vmatmul.mubr.msk.bf16.gmra.mrb[8].mxu0 %vm609_vm5, %v4454_v55 }
 0x154   :  { %3274 = vmatprep.mubr.msk.bf16.mxu0 %vm609_vm5, %v4479_v18 }
 0x157   :  { %3377 = vmatmul.mubr.msk.bf16.gmra.mrb[12].mxu1 %vm609_vm5, %v4493_v29 }
 0x158   :  { %3380 = vmatprep.mubr.msk.bf16.mxu1 %vm609_vm5, %v4500_v33 }
 0x15b   :  { %3275 = vmatmul.mubr.msk.bf16.gmra.mrb[12].mxu0 %vm609_vm5, %v4486_v38 }
 0x15c   :  { %3278 = vmatprep.mubr.msk.bf16.mxu0 %vm609_vm5, %v4507_v47 }
 0x15f   :  { %3381 = vmatmul.mubr.msk.bf16.gmra.mrb[16].mxu1 %vm609_vm5, %v4521_v62 }
 0x160   :  { %3384 = vmatprep.mubr.msk.bf16.mxu1 %vm609_vm5, %v4528_v23 }
 0x163   :  { %3279 = vmatmul.mubr.msk.bf16.gmra.mrb[16].mxu0 %vm609_vm5, %v4514_v58 }
 0x164   :  { %3282 = vmatprep.mubr.msk.bf16.mxu0 %vm609_vm5, %v4535_v12 }
 0x167   :  { %3385 = vmatmul.mubr.msk.bf16.gmra.mrb[20].mxu1 %vm609_vm5, %v4549_v21 }
 0x168   :  { %3388 = vmatprep.mubr.msk.bf16.mxu1 %vm609_vm5, %v4556_v56 }
 0x16b   :  { %3283 = vmatmul.mubr.msk.bf16.gmra.mrb[20].mxu0 %vm609_vm5, %v4542_v17 }
 0x16c   :  { %3286 = vmatprep.mubr.msk.bf16.mxu0 %vm609_vm5, %v4563_v43 }
 0x16f   :  { %3389 = vmatmul.mubr.msk.bf16.gmra.mrb[24].mxu1 %vm609_vm5, %v4582_v30 }
 0x170   :  { %3392 = vmatprep.mubr.msk.bf16.mxu1 %vm609_vm5, %v4579_v3 }
 0x173   :  { %3287 = vmatmul.mubr.msk.bf16.gmra.mrb[24].mxu0 %vm609_vm5, %v4572_v63 }
 0x174   :  { %3290 = vmatprep.mubr.msk.bf16.mxu0 %vm609_vm5, %v4593_v10 }
 0x177   :  { %3393 = vmatmul.mubr.msk.bf16.gmra.mrb[28].mxu1 %vm609_vm5, %v2418_v52 }
 0x17b   :  { %3291 = vmatmul.mubr.msk.bf16.gmra.mrb[28].mxu0 %vm609_vm5, %v1008_v42 }
 0x212   :  { %v4733_v50 = vpop.f32.mrb[0].mxu1 }
 0x213   :  { %v4735_v48 = vpop.f32.mrb[1].mxu1 }
 0x214   :  { %v4737_v61 = vpop.f32.mrb[2].mxu1 }
 0x215   :  { %v4739_v5 = vpop.f32.mrb[3].mxu1 }
 0x216   :  { %v2624_v22 = vadd.f32 %v4739_v5, %v4735_v48  ;;  %v4743_v19 = vpop.f32.mrb[0].mxu0 }
 0x217   :  { %v4745_v13 = vpop.f32.mrb[1].mxu0 }
 0x218   :  { %v2625_v31 = vadd.f32 %v4733_v50, %v2624_v22  ;;  %v4748_v40 = vpop.f32.mrb[2].mxu0 }
 0x219   :  { %v4750_v55 = vpop.f32.mrb[3].mxu0 }
 0x21a   :  { %v1215_v44 = vadd.f32 %v4750_v55, %v4745_v13  ;;  %v4754_v7 = vpop.f32.mrb[4].mxu1  ;;  %v2626_v18 = vadd.f32 %v4737_v61, %v2625_v31 }
 0x21b   :  { %v4757_v38 = vpop.f32.mrb[5].mxu1 }
 0x21c   :  { %v1216_v29 = vadd.f32 %v4743_v19, %v1215_v44  ;;  %v2627_v33 = vadd.f32 %v2626_v18, %v4757_v38  ;;  %v4761_v47 = vpop.f32.mrb[6].mxu1 }
 0x21d   :  { %v4763_v58 = vpop.f32.mrb[7].mxu1 }
 0x21e   :  { %v2628_v62 = vadd.f32 %v2627_v33, %v4763_v58  ;;  %v4766_v23 = vpop.f32.mrb[4].mxu0  ;;  %v1217_v12 = vadd.f32 %v4748_v40, %v1216_v29 }
 0x21f   :  { %v4769_v17 = vpop.f32.mrb[5].mxu0 }
 0x220   :  { %v2629_v54 = vadd.f32 %v4754_v7, %v2628_v62  ;;  %v1218_v21 = vadd.f32 %v1217_v12, %v4769_v17  ;;  %v4773_v32 = vpop.f32.mrb[6].mxu0 }
 0x221   :  { %v4775_v27 = vpop.f32.mrb[7].mxu0 }
 0x222   :  { %v1219_v34 = vadd.f32 %v1218_v21, %v4775_v27  ;;  %v4778_v36 = vpop.f32.mrb[8].mxu1  ;;  %v2630_v56 = vadd.f32 %v4761_v47, %v2629_v54 }
 0x223   :  { %v4781_v11 = vpop.f32.mrb[9].mxu1 }
 0x224   :  { %v1220_v39 = vadd.f32 %v4766_v23, %v1219_v34  ;;  %v2631_v41 = vadd.f32 %v2630_v56, %v4781_v11  ;;  %v4785_v43 = vpop.f32.mrb[10].mxu1 }
 0x225   :  { %v4787_v53 = vpop.f32.mrb[11].mxu1 }
 0x226   :  { %v2632_v57 = vadd.f32 %v2631_v41, %v4787_v53  ;;  %v4790_v51 = vpop.f32.mrb[8].mxu0  ;;  %v1221_v16 = vadd.f32 %v4773_v32, %v1220_v39 }
 0x227   :  { %5191 = vst [vmem:[#allocation2_spill] sm:$0xff] %v4790_v51  ;;  %v4793_v59 = vpop.f32.mrb[9].mxu0 }
 0x228   :  { %v2633_v0 = vadd.f32 %v4778_v36, %v2632_v57  ;;  %v1222_v63 = vadd.f32 %v1221_v16, %v4793_v59  ;;  %v4797_v45 = vpop.f32.mrb[10].mxu0 }
 0x229   :  { %5192 = vst [vmem:[#allocation3_spill] sm:$0xff] %v4797_v45  ;;  %v4799_v2 = vpop.f32.mrb[11].mxu0 }
 0x22a   :  { %5193 = vst [vmem:[#allocation4_spill] sm:$0xff] %v4799_v2  ;;  %v1223_v3 = vadd.f32 %v1222_v63, %v4799_v2  ;;  %v4802_v37 = vpop.f32.mrb[12].mxu1  ;;  %v2634_v30 = vadd.f32 %v4785_v43, %v2633_v0 }
 0x22b   :  { %v4805_v46 = vpop.f32.mrb[13].mxu1 }
 0x22c   :  { %v1224_v24 = vadd.f32 %v4790_v51, %v1223_v3  ;;  %v2635_v8 = vadd.f32 %v2634_v30, %v4805_v46  ;;  %v4809_v9 = vpop.f32.mrb[14].mxu1 }
 0x22d   :  { %v4811_v10 = vpop.f32.mrb[15].mxu1 }
 0x22e   :  { %v2636_v28 = vadd.f32 %v2635_v8, %v4811_v10  ;;  %v4814_v6 = vpop.f32.mrb[12].mxu0  ;;  %v1225_v4 = vadd.f32 %v4797_v45, %v1224_v24 }
 0x22f   :  { %5194 = vst [vmem:[#allocation5_spill] sm:$0xff] %v4814_v6  ;;  %v4817_v26 = vpop.f32.mrb[13].mxu0 }
 0x230   :  { %5195 = vst [vmem:[#allocation6_spill] sm:$0xff] %v4817_v26  ;;  %v2637_v14 = vadd.f32 %v4802_v37, %v2636_v28  ;;  %v1226_v20 = vadd.f32 %v1225_v4, %v4817_v26  ;;  %v4821_v35 = vpop.f32.mrb[14].mxu0 }
 0x231   :  { %5196 = vst [vmem:[#allocation7_spill] sm:$0xff] %v4821_v35  ;;  %v4823_v1 = vpop.f32.mrb[15].mxu0 }
 0x232   :  { %v1227_v25 = vadd.f32 %v1226_v20, %v4823_v1  ;;  %v4826_v49 = vpop.f32.mrb[16].mxu1  ;;  %v2638_v52 = vadd.f32 %v4809_v9, %v2637_v14 }
 0x233   :  { %v3573_v60 = vpack.i.bf16 %v4826_v49, %v4733_v50  ;;  %v4831_v15 = vpop.f32.mrb[17].mxu1 }
 0x234   :  { %v1228_v42 = vadd.f32 %v4814_v6, %v1227_v25  ;;  %v2639_v22 = vadd.f32 %v2638_v52, %v4831_v15  ;;  %v4835_v31 = vpop.f32.mrb[18].mxu1  ;;  %v3569_v44 = vpack.i.bf16 %v4831_v15, %v4735_v48 }
 0x235   :  { %v3575_v18 = vpack.i.bf16 %v4835_v31, %v4737_v61  ;;  %v4841_v29 = vpop.f32.mrb[19].mxu1 }
 0x236   :  { %v3571_v33 = vpack.i.bf16 %v4841_v29, %v4739_v5  ;;  %v2640_v62 = vadd.f32 %v2639_v22, %v4841_v29  ;;  %3570 = vxpose.xlu1.b32.start [1/16] (narrow) %v3569_v44, 8  ;;  %v4846_v12 = vpop.f32.mrb[16].mxu0  ;;  %v1229_v54 = vadd.f32 %v4821_v35, %v1228_v42 }
 0x237   :  { %5197 = vst [vmem:[#allocation8_spill] sm:$0xff] %v4846_v12  ;;  %v3536_v21 = vpack.i.bf16 %v4846_v12, %v4743_v19  ;;  %v4851_v34 = vpop.f32.mrb[17].mxu0 }
 0x238   :  { %5198 = vst [vmem:[#allocation9_spill] sm:$0xff] %v4851_v34  ;;  %v2641_v56 = vadd.f32 %v4826_v49, %v2640_v62  ;;  %v1230_v39 = vadd.f32 %v1229_v54, %v4851_v34  ;;  %v4855_v41 = vpop.f32.mrb[18].mxu0  ;;  %v3532_v57 = vpack.i.bf16 %v4851_v34, %v4745_v13 }
 0x239   :  { %5199 = vst [vmem:[#allocation10_spill] sm:$0xff] %v4855_v41  ;;  %v3538_v16 = vpack.i.bf16 %v4855_v41, %v4748_v40  ;;  %v4861_v0 = vpop.f32.mrb[19].mxu0 }
 0x23a   :  { %5200 = vst [vmem:[#allocation11_spill] sm:$0xff] %v4861_v0  ;;  %v3534_v63 = vpack.i.bf16 %v4861_v0, %v4750_v55  ;;  %v1231_v3 = vadd.f32 %v1230_v39, %v4861_v0  ;;  %3572 = vxpose.xlu1.b32.cont [2/16] (narrow) %v3571_v33, 8  ;;  %v4866_v30 = vpop.f32.mrb[20].mxu1  ;;  %3533 = vxpose.xlu0.b32.start [1/16] (narrow) %v3532_v57, 8 }
 0x23b   :  { %v2642_v24 = vadd.f32 %v4835_v31, %v2641_v56  ;;  %v4871_v28 = vpop.f32.mrb[21].mxu1 }
 0x23c   :  { %5201 = vst [vmem:[#allocation12_spill] sm:$0xff] %v4871_v28  ;;  %v1232_v4 = vadd.f32 %v4846_v12, %v1231_v3  ;;  %v3577_v14 = vpack.i.bf16 %v4871_v28, %v4757_v38  ;;  %v4877_v25 = vpop.f32.mrb[22].mxu1 }
 0x23d   :  { %v2643_v20 = vadd.f32 %v2642_v24, %v4871_v28  ;;  %v4881_v42 = vpop.f32.mrb[23].mxu1 }
 0x23e   :  { %5202 = vst [vmem:[#allocation13_spill] sm:$0xff] %v4881_v42  ;;  %v3579_v22 = vpack.i.bf16 %v4881_v42, %v4763_v58  ;;  %3574 = vxpose.xlu1.b32.cont [3/16] (narrow) %v3573_v60, 8  ;;  %3535 = vxpose.xlu0.b32.cont [2/16] (narrow) %v3534_v63, 8  ;;  %v4886_v33 = vpop.f32.mrb[20].mxu0  ;;  %v1233_v62 = vadd.f32 %v4855_v41, %v1232_v4 }
 0x23f   :  { %v2644_v44 = vadd.f32 %v2643_v20, %v4881_v42  ;;  %5203 = vst [vmem:[#allocation14_spill] sm:$0xff] %v4886_v33  ;;  %v4891_v56 = vpop.f32.mrb[21].mxu0 }
 0x240   :  { %5204 = vst [vmem:[#allocation15_spill] sm:$0xff] %v4891_v56  ;;  %v3540_v57 = vpack.i.bf16 %v4891_v56, %v4769_v17  ;;  %v1234_v3 = vadd.f32 %v1233_v62, %v4891_v56  ;;  %v4897_v24 = vpop.f32.mrb[22].mxu0 }
 0x241   :  { %v2645_v39 = vadd.f32 %v4866_v30, %v2644_v44  ;;  %v4901_v63 = vpop.f32.mrb[23].mxu0 }
 0x242   :  { %5205 = vst [vmem:[#allocation16_spill] sm:$0xff] %v4901_v63  ;;  %v3542_v4 = vpack.i.bf16 %v4901_v63, %v4775_v27  ;;  %v1235_v20 = vadd.f32 %v1234_v3, %v4901_v63  ;;  %3576 = vxpose.xlu1.b32.cont [4/16] (narrow) %v3575_v18, 8  ;;  %v4906_v54 = vpop.f32.mrb[24].mxu1  ;;  %3537 = vxpose.xlu0.b32.cont [3/16] (narrow) %v3536_v21, 8 }
 0x243   :  { %v2646_v44 = vadd.f32 %v4877_v25, %v2645_v39  ;;  %v4911_v52 = vpop.f32.mrb[25].mxu1 }
 0x244   :  { %5206 = vst [vmem:[#allocation17_spill] sm:$0xff] %v4911_v52  ;;  %v1236_v60 = vadd.f32 %v4886_v33, %v1235_v20  ;;  %v3585_v8 = vpack.i.bf16 %v4911_v52, %v4781_v11  ;;  %v4917_v41 = vpop.f32.mrb[26].mxu1 }
 0x245   :  { %v2647_v56 = vadd.f32 %v2646_v44, %v4911_v52  ;;  %v4921_v21 = vpop.f32.mrb[27].mxu1 }
 0x246   :  { %5207 = vst [vmem:[#allocation18_spill] sm:$0xff] %v4921_v21  ;;  %v3587_v39 = vpack.i.bf16 %v4921_v21, %v4787_v53  ;;  %3578 = vxpose.xlu1.b32.cont [5/16] (narrow) %v3577_v14, 8  ;;  %3539 = vxpose.xlu0.b32.cont [4/16] (narrow) %v3538_v16, 8  ;;  %v4926_v20 = vpop.f32.mrb[24].mxu0  ;;  %v1237_v62 = vadd.f32 %v4897_v24, %v1236_v60 }
 0x247   :  { %v2648_v3 = vadd.f32 %v2647_v56, %v4921_v21  ;;  %5208 = vst [vmem:[#allocation19_spill] sm:$0xff] %v4926_v20  ;;  %v3552_v44 = vpack.i.bf16 %v4926_v20, %v4790_v51  ;;  %v4931_v63 = vpop.f32.mrb[25].mxu0 }
 0x248   :  { %5209 = vst [vmem:[#allocation20_spill] sm:$0xff] %v4931_v63  ;;  %v3548_v12 = vpack.i.bf16 %v4931_v63, %v4793_v59  ;;  %v1238_v0 = vadd.f32 %v1237_v62, %v4931_v63  ;;  %v4937_v34 = vpop.f32.mrb[26].mxu0 }
 0x249   :  { %v2649_v18 = vadd.f32 %v4906_v54, %v2648_v3  ;;  %5210 = vst [vmem:[#allocation21_spill] sm:$0xff] %v4937_v34  ;;  %v3554_v16 = vpack.i.bf16 %v4937_v34, %v4797_v45  ;;  %v4941_v14 = vpop.f32.mrb[27].mxu0 }
 0x24a   :  { %5211 = vst [vmem:[#allocation22_spill] sm:$0xff] %v4941_v14  ;;  %v3550_v56 = vpack.i.bf16 %v4941_v14, %v4799_v2  ;;  %v1239_v60 = vadd.f32 %v1238_v0, %v4941_v14  ;;  %3580 = vxpose.xlu1.b32.cont [6/16] (narrow) %v3579_v22, 8  ;;  %v4946_v21 = vpop.f32.mrb[28].mxu1  ;;  %3541 = vxpose.xlu0.b32.cont [5/16] (narrow) %v3540_v57, 8 }
 0x24b   :  { %5212 = vst [vmem:[#allocation23_spill] sm:$0xff] %v4946_v21  ;;  %v2650_v3 = vadd.f32 %v4917_v41, %v2649_v18  ;;  %v3597_v62 = vpack.i.bf16 %v4946_v21, %v4802_v37  ;;  %v4951_v63 = vpop.f32.mrb[29].mxu1 }
 0x24c   :  { %5213 = vst [vmem:[#allocation24_spill] sm:$0xff] %v4951_v63  ;;  %v1240_v52 = vadd.f32 %v4926_v20, %v1239_v60  ;;  %v3593_v45 = vpack.i.bf16 %v4951_v63, %v4805_v46  ;;  %v4957_v42 = vpop.f32.mrb[30].mxu1  ;;  %v5215_v60 = vpack.i.bf16 %v4866_v30, %v4754_v7 }
 0x24d   :  { %v2651_v51 = vadd.f32 %v2650_v3, %v4951_v63  ;;  %v3599_v0 = vpack.i.bf16 %v4957_v42, %v4809_v9  ;;  %v4961_v22 = vpop.f32.mrb[31].mxu1 }
 0x24e   :  { %5214 = vst [vmem:[#allocation25_spill] sm:$0xff] %v4961_v22  ;;  %v3595_v57 = vpack.i.bf16 %v4961_v22, %v4811_v10  ;;  %3582 = vxpose.xlu1.b32.cont [7/16] (narrow) %v5215_v60, 8  ;;  %3543 = vxpose.xlu0.b32.cont [6/16] (narrow) %v3542_v4, 8  ;;  %v4969_v20 = vpop.f32.mrb[28].mxu0  ;;  %v1241_v3 = vadd.f32 %v4937_v34, %v1240_v52 }
 0x24f   :  { %v2652_v18 = vadd.f32 %v2651_v51, %v4961_v22  ;;  %v3560_v14 = vpack.i.bf16 %v4969_v20, %v4814_v6  ;;  %v4974_v63 = vpop.f32.mrb[29].mxu0 }
 0x250   :  { %5216 = vst [vmem:[#allocation26_spill] sm:$0xff] %v4974_v63  ;;  %v3556_v28 = vpack.i.bf16 %v4974_v63, %v4817_v26  ;;  %v1242_v51 = vadd.f32 %v1241_v3, %v4974_v63  ;;  %v4980_v22 = vpop.f32.mrb[30].mxu0  ;;  %v5219_v3 = vpack.i.bf16 %v4886_v33, %v4766_v23  ;;  %v5221_v33 = vpack.i.bf16 %v4906_v54, %v4778_v36 }
 0x251   :  { %v2653_v2 = vadd.f32 %v4946_v21, %v2652_v18  ;;  %v3562_v4 = vpack.i.bf16 %v4980_v22, %v4821_v35  ;;  %v4984_v60 = vpop.f32.mrb[31].mxu0  ;;  %v5218_v18 = vpack.i.bf16 %v4877_v25, %v4761_v47 }
 0x252   :  { %5217 = vst [vmem:[#allocation27_spill] sm:$0xff] %v4984_v60  ;;  %v3558_v34 = vpack.i.bf16 %v4984_v60, %v4823_v1  ;;  %v1243_v6 = vadd.f32 %v1242_v51, %v4984_v60  ;;  %3545 = vxpose.xlu0.b32.cont [7/16] (narrow) %v5219_v3, 8 }
 0x253   :  { %v2654_v52 = vadd.f32 %v4957_v42, %v2653_v2  ;;  %3584 = vxpose.xlu1.b32.cont [8/16] (narrow) %v5218_v18, 8  ;;  %v5220_v2 = vpack.i.bf16 %v4897_v24, %v4773_v32 }
 0x254   :  { %v1244_v21 = vadd.f32 %v4969_v20, %v1243_v6  ;;  %v5222_v6 = vpack.i.bf16 %v4917_v41, %v4785_v43 }
 0x255   :  { %v2655_v63 = vrot.slane %v2654_v52, 4 }
 0x256   :  { %v1245_v26 = vadd.f32 %v4980_v22, %v1244_v21  ;;  %3547 = vxpose.xlu0.b32.cont [8/16] (narrow) %v5220_v2, 8 }
 0x257   :  { %v2656_v35 = vadd.f32 %v2655_v63, %v2654_v52  ;;  %3586 = vxpose.xlu1.b32.cont [9/16] (narrow) %v3585_v8, 8 }
 0x258   :  { %v1246_v8 = vrot.slane %v1245_v26, 4 }
 0x259   :  { %v2657_v51 = vrot.slane %v2656_v35, 2 }
 0x25a   :  { %3549 = vxpose.xlu0.b32.cont [9/16] (narrow) %v3548_v12, 8 }
 0x25b   :  { %v2658_v60 = vadd.f32 %v2657_v51, %v2656_v35  ;;  %3588 = vxpose.xlu1.b32.cont [10/16] (narrow) %v3587_v39, 8  ;;  %v1247_v35 = vadd.f32 %v1246_v8, %v1245_v26 }
 0x25d   :  { %v2659_v18 = vrot.slane %v2658_v60, 1  ;;  %v1248_v21 = vrot.slane %v1247_v35, 2 }
 0x25e   :  { %3551 = vxpose.xlu0.b32.cont [10/16] (narrow) %v3550_v56, 8 }
 0x25f   :  { %3590 = vxpose.xlu1.b32.cont [11/16] (narrow) %v5221_v33, 8  ;;  %v5004_v3 = vadd.f32 %v2659_v18, %v2658_v60  ;;  %v1249_v26 = vadd.f32 %v1248_v21, %v1247_v35 }
 0x261   :  { %v5010_v63 = vmul.f32 0.00390625, %v5004_v3 }
 0x262   :  { %3553 = vxpose.xlu0.b32.cont [11/16] (narrow) %v3552_v44, 8 }
 0x263   :  { %3592 = vxpose.xlu1.b32.cont [12/16] (narrow) %v5222_v6, 8  ;;  %v2662_v12 = vsub.f32 %v4735_v48, %v5010_v63  ;;  %v2663_v33 = vsub.f32 %v4739_v5, %v5010_v63  ;;  %v2664_v39 = vsub.f32 %v4733_v50, %v5010_v63  ;;  %v2666_v48 = vsub.f32 %v4757_v38, %v5010_v63 }
 0x264   :  { %v2667_v5 = vsub.f32 %v4763_v58, %v5010_v63  ;;  %v2671_v18 = vsub.f32 %v4787_v53, %v5010_v63 }
 0x265   :  { %v2694_v44 = vmul.f32 %v2662_v12, %v2662_v12  ;;  %v2695_v56 = vmul.f32 %v2663_v33, %v2663_v33  ;;  %v2673_v12 = vsub.f32 %v4785_v43, %v5010_v63 }
 0x266   :  { %3555 = vxpose.xlu0.b32.cont [12/16] (narrow) %v3554_v16, 8  ;;  %v2696_v16 = vmul.f32 %v2664_v39, %v2664_v39  ;;  %v2699_v38 = vmul.f32 %v2667_v5, %v2667_v5  ;;  %v2703_v33 = vmul.f32 %v2671_v18, %v2671_v18  ;;  %v2674_v39 = vsub.f32 %v4805_v46, %v5010_v63 }
 0x267   :  { %3594 = vxpose.xlu1.b32.cont [13/16] (narrow) %v3593_v45, 8  ;;  %v2665_v45 = vsub.f32 %v4737_v61, %v5010_v63  ;;  %v2726_v60 = vadd.f32 %v2695_v56, %v2694_v44  ;;  %v2669_v61 = vsub.f32 %v4761_v47, %v5010_v63  ;;  %v2672_v47 = vsub.f32 %v4778_v36, %v5010_v63 }
 0x268   :  { %v2675_v36 = vsub.f32 %v4811_v10, %v5010_v63  ;;  %v2677_v5 = vsub.f32 %v4809_v9, %v5010_v63  ;;  %v2679_v9 = vsub.f32 %v4841_v29, %v5010_v63  ;;  %v2681_v29 = vsub.f32 %v4835_v31, %v5010_v63 }
 0x269   :  { %v2727_v50 = vadd.f32 %v2726_v60, %v2696_v16  ;;  %v2701_v6 = vmul.f32 %v2669_v61, %v2669_v61  ;;  %v2704_v44 = vmul.f32 %v2672_v47, %v2672_v47  ;;  %v2706_v60 = vmul.f32 %v2674_v39, %v2674_v39 }
 0x26a   :  { %3557 = vxpose.xlu0.b32.cont [13/16] (narrow) %v3556_v28, 8  ;;  %v2697_v28 = vmul.f32 %v2665_v45, %v2665_v45  ;;  %v2705_v45 = vmul.f32 %v2673_v12, %v2673_v12  ;;  %v2711_v47 = vmul.f32 %v2679_v9, %v2679_v9 }
 0x26b   :  { %3596 = vxpose.xlu1.b32.cont [14/16] (narrow) %v3595_v57, 8  ;;  %v1250_v57 = vrot.slane %v1249_v26, 1 }
 0x26c   :  { %v2728_v52 = vadd.f32 %v2727_v50, %v2697_v28  ;;  %v2707_v28 = vmul.f32 %v2675_v36, %v2675_v36  ;;  %v2713_v36 = vmul.f32 %v2681_v29, %v2681_v29 }
 0x26d   :  { %v5028_v51 = vadd.f32 %v1250_v57, %v1249_v26 }
 0x26e   :  { %3559 = vxpose.xlu0.b32.cont [14/16] (narrow) %v3558_v34, 8  ;;  %v2668_v34 = vsub.f32 %v4754_v7, %v5010_v63 }
 0x26f   :  { %3598 = vxpose.xlu1.b32.cont [15/16] (narrow) %v3597_v62, 8  ;;  %v2698_v62 = vmul.f32 %v2666_v48, %v2666_v48  ;;  %v5035_v8 = vmul.f32 0.00390625, %v5028_v51 }
 0x270   :  { %v2700_v58 = vmul.f32 %v2668_v34, %v2668_v34  ;;  %v2678_v34 = vsub.f32 %v4831_v15, %v5010_v63  ;;  %v2680_v15 = vsub.f32 %v4826_v49, %v5010_v63 }
 0x271   :  { %v2729_v2 = vadd.f32 %v2728_v52, %v2698_v62  ;;  %v1253_v21 = vsub.f32 %v4745_v13, %v5035_v8  ;;  %v1254_v53 = vsub.f32 %v4750_v55, %v5035_v8  ;;  %v1255_v43 = vsub.f32 %v4743_v19, %v5035_v8 }
 0x272   :  { %3561 = vxpose.xlu0.b32.cont [15/16] (narrow) %v3560_v14, 8  ;;  %v2670_v14 = vsub.f32 %v4781_v11, %v5010_v63  ;;  %v2676_v13 = vsub.f32 %v4802_v37, %v5010_v63  ;;  %v1256_v46 = vsub.f32 %v4748_v40, %v5035_v8  ;;  %v1257_v50 = vsub.f32 %v4769_v17, %v5035_v8 }
 0x273   :  { %3600 = vxpose.xlu1.b32.end [16/16] (narrow) %v3599_v0, 8  ;;  %v2730_v0 = vadd.f32 %v2729_v2, %v2699_v38  ;;  %v1285_v48 = vmul.f32 %v1253_v21, %v1253_v21  ;;  %v1286_v16 = vmul.f32 %v1254_v53, %v1254_v53  ;;  %v1287_v57 = vmul.f32 %v1255_v43, %v1255_v43  ;;  %v5224_v53 = vld [vmem:[#allocation4_spill] sm:$0xff] }
 0x274   :  { %v2708_v62 = vmul.f32 %v2676_v13, %v2676_v13  ;;  %v1258_v52 = vsub.f32 %v4775_v27, %v5035_v8  ;;  %v1288_v61 = vmul.f32 %v1256_v46, %v1256_v46  ;;  %v2709_v38 = vmul.f32 %v2677_v5, %v2677_v5 }
 0x275   :  { %v2731_v7 = vadd.f32 %v2730_v0, %v2700_v58  ;;  %v1317_v19 = vadd.f32 %v1286_v16, %v1285_v48  ;;  %v1259_v17 = vsub.f32 %v4766_v23, %v5035_v8  ;;  %v2710_v0 = vmul.f32 %v2678_v34, %v2678_v34 }
 0x276   :  { %3563 = vxpose.xlu0.b32.end [16/16] (narrow) %v3562_v4, 8  ;;  %v2702_v4 = vmul.f32 %v2670_v14, %v2670_v14  ;;  %v1289_v14 = vmul.f32 %v1257_v50, %v1257_v50  ;;  %v1260_v27 = vsub.f32 %v4773_v32, %v5035_v8  ;;  %v1261_v23 = vsub.f32 %v4793_v59, %v5035_v8 }
 0x277   :  { %v2732_v35 = vadd.f32 %v2731_v7, %v2701_v6  ;;  %v1318_v40 = vadd.f32 %v1317_v19, %v1287_v57  ;;  %v1290_v6 = vmul.f32 %v1258_v52, %v1258_v52  ;;  %v1262_v32 = vsub.f32 %v5224_v53, %v5035_v8  ;;  %v5228_v19 = vld [vmem:[#allocation6_spill] sm:$0xff]  ;;  %v5229_v52 = vld [vmem:[#allocation17_spill] sm:$0xff] }
 0x278   :  { %v1292_v39 = vmul.f32 %v1260_v27, %v1260_v27  ;;  %v1293_v43 = vmul.f32 %v1261_v23, %v1261_v23  ;;  %v2684_v16 = vsub.f32 %v4866_v30, %v5010_v63  ;;  %v1265_v34 = vsub.f32 %v5228_v19, %v5035_v8 }
 0x279   :  { %v2733_v11 = vadd.f32 %v2732_v35, %v2702_v4  ;;  %v1319_v58 = vadd.f32 %v1318_v40, %v1288_v61  ;;  %v1291_v35 = vmul.f32 %v1259_v17, %v1259_v17  ;;  %v1294_v5 = vmul.f32 %v1262_v32, %v1262_v32  ;;  %v5230_v17 = vld [vmem:[#allocation18_spill] sm:$0xff]  ;;  %v5234_v32 = vld [vmem:[#allocation24_spill] sm:$0xff] }
 0x27a   :  { %v2686_v30 = vsub.f32 %v5229_v52, %v5010_v63  ;;  %v2716_v61 = vmul.f32 %v2684_v16, %v2684_v16  ;;  %v1266_v9 = vsub.f32 %v4823_v1, %v5035_v8  ;;  %v5240_v52 = vld [vmem:[#allocation15_spill] sm:$0xff] }
 0x27b   :  { %v2734_v56 = vadd.f32 %v2733_v11, %v2703_v33  ;;  %v1320_v7 = vadd.f32 %v1319_v58, %v1289_v14  ;;  %v5223_v33 = vld [vmem:[#allocation12_spill] sm:$0xff]  ;;  %v2712_v11 = vmul.f32 %v2680_v15, %v2680_v15  ;;  %v5231_v15 = vld [vmem:[#allocation5_spill] sm:$0xff] }
 0x27c   :  { %v2682_v49 = vsub.f32 %v5223_v33, %v5010_v63 }
 0x27d   :  { %v2735_v26 = vadd.f32 %v2734_v56, %v2704_v44  ;;  %v1321_v12 = vadd.f32 %v1320_v7, %v1290_v6  ;;  %v5225_v56 = vld [vmem:[#allocation13_spill] sm:$0xff]  ;;  %v2688_v6 = vsub.f32 %v4906_v54, %v5010_v63  ;;  %v2718_v7 = vmul.f32 %v2686_v30, %v2686_v30 }
 0x27e   :  { %v2683_v31 = vsub.f32 %v5225_v56, %v5010_v63  ;;  %v2714_v13 = vmul.f32 %v2682_v49, %v2682_v49  ;;  %v5233_v49 = vld [vmem:[#allocation9_spill] sm:$0xff]  ;;  %v2690_v54 = vsub.f32 %v5234_v32, %v5010_v63  ;;  %v5235_v56 = vld [vmem:[#allocation11_spill] sm:$0xff]  ;;  %v1273_v30 = vsub.f32 %v5240_v52, %v5035_v8 }
 0x27f   :  { %v2736_v55 = vadd.f32 %v2735_v26, %v2705_v45  ;;  %v1322_v44 = vadd.f32 %v1321_v12, %v1291_v35  ;;  %v5226_v26 = vld [vmem:[#allocation2_spill] sm:$0xff]  ;;  %v2689_v35 = vsub.f32 %v4917_v41, %v5010_v63  ;;  %v5245_v32 = vld [vmem:[#allocation19_spill] sm:$0xff] }
 0x280   :  { %v1263_v59 = vsub.f32 %v5226_v26, %v5035_v8  ;;  %v2715_v50 = vmul.f32 %v2683_v31, %v2683_v31  ;;  %v1270_v31 = vsub.f32 %v5235_v56, %v5035_v8  ;;  %v5236_v26 = vld [vmem:[#allocation25_spill] sm:$0xff] }
 0x281   :  { %v2737_v10 = vadd.f32 %v2736_v55, %v2706_v60  ;;  %v1323_v48 = vadd.f32 %v1322_v44, %v1292_v39  ;;  %v5227_v55 = vld [vmem:[#allocation3_spill] sm:$0xff]  ;;  %v2720_v39 = vmul.f32 %v2688_v6, %v2688_v6  ;;  %v2691_v41 = vsub.f32 %v5236_v26, %v5010_v63 }
 0x282   :  { %v1264_v46 = vsub.f32 %v5227_v55, %v5035_v8  ;;  %v5238_v55 = vld [vmem:[#allocation23_spill] sm:$0xff]  ;;  %v1276_v6 = vsub.f32 %v4897_v24, %v5035_v8 }
 0x283   :  { %v2738_v37 = vadd.f32 %v2737_v10, %v2707_v28  ;;  %v1324_v28 = vadd.f32 %v1323_v48, %v1293_v43  ;;  %v2685_v10 = vsub.f32 %v4877_v25, %v5010_v63  ;;  %v2687_v25 = vsub.f32 %v5230_v17, %v5010_v63  ;;  %v5237_v48 = vld [vmem:[#allocation8_spill] sm:$0xff] }
 0x284   :  { %v1271_v16 = vsub.f32 %v5237_v48, %v5035_v8 }
 0x285   :  { %v2739_v2 = vadd.f32 %v2738_v37, %v2708_v62  ;;  %v1295_v62 = vmul.f32 %v1263_v59, %v1263_v59  ;;  %v1325_v37 = vadd.f32 %v1324_v28, %v1294_v5  ;;  %v2717_v14 = vmul.f32 %v2685_v10, %v2685_v10  ;;  %v5239_v10 = vld [vmem:[#allocation10_spill] sm:$0xff] }
 0x286   :  { %v2719_v12 = vmul.f32 %v2687_v25, %v2687_v25  ;;  %v2721_v59 = vmul.f32 %v2689_v35, %v2689_v35  ;;  %v2722_v5 = vmul.f32 %v2690_v54, %v2690_v54  ;;  %v1279_v54 = vsub.f32 %v5245_v32, %v5035_v8 }
 0x287   :  { %v2740_v18 = vadd.f32 %v2739_v2, %v2709_v38  ;;  %v1296_v38 = vmul.f32 %v1264_v46, %v1264_v46  ;;  %v1326_v2 = vadd.f32 %v1325_v37, %v1295_v62  ;;  %v2692_v46 = vsub.f32 %v5238_v55, %v5010_v63 }
 0x288   :  { %v2723_v62 = vmul.f32 %v2691_v41, %v2691_v41 }
 0x289   :  { %v2741_v4 = vadd.f32 %v2740_v18, %v2710_v0  ;;  %v1267_v0 = vsub.f32 %v5231_v15, %v5035_v8  ;;  %v1297_v18 = vmul.f32 %v1265_v34, %v1265_v34  ;;  %v1327_v27 = vadd.f32 %v1326_v2, %v1296_v38  ;;  %v5241_v2 = vld [vmem:[#allocation16_spill] sm:$0xff] }
 0x28a   :  { %v2693_v34 = vsub.f32 %v4957_v42, %v5010_v63  ;;  %v1274_v17 = vsub.f32 %v5241_v2, %v5035_v8  ;;  %v1305_v42 = vmul.f32 %v1273_v30, %v1273_v30 }
 0x28b   :  { %v2742_v21 = vadd.f32 %v2741_v4, %v2711_v47  ;;  %v5232_v47 = vld [vmem:[#allocation7_spill] sm:$0xff]  ;;  %v1298_v4 = vmul.f32 %v1266_v9, %v1266_v9  ;;  %v1328_v23 = vadd.f32 %v1327_v27, %v1297_v18  ;;  %v2724_v9 = vmul.f32 %v2692_v46, %v2692_v46 }
 0x28c   :  { %v1268_v1 = vsub.f32 %v5232_v47, %v5035_v8 }
 0x28d   :  { %v2743_v45 = vadd.f32 %v2742_v21, %v2712_v11  ;;  %v1269_v11 = vsub.f32 %v5233_v49, %v5035_v8  ;;  %v1299_v21 = vmul.f32 %v1267_v0, %v1267_v0  ;;  %v1329_v53 = vadd.f32 %v1328_v23, %v1298_v4  ;;  %v5242_v0 = vld [vmem:[#allocation14_spill] sm:$0xff] }
 0x28e   :  { %v1275_v18 = vsub.f32 %v5242_v0, %v5035_v8 }
 0x28f   :  { %v2744_v60 = vadd.f32 %v2743_v45, %v2713_v36  ;;  %v1300_v36 = vmul.f32 %v1268_v1, %v1268_v1  ;;  %v1330_v45 = vadd.f32 %v1329_v53, %v1299_v21  ;;  %v5243_v1 = vld [vmem:[#allocation20_spill] sm:$0xff] }
 0x290   :  { %v1277_v4 = vsub.f32 %v5243_v1, %v5035_v8  ;;  %v1307_v23 = vmul.f32 %v1275_v18, %v1275_v18 }
 0x291   :  { %v2745_v57 = vadd.f32 %v2744_v60, %v2714_v13  ;;  %v1301_v13 = vmul.f32 %v1269_v11, %v1269_v11  ;;  %v1331_v60 = vadd.f32 %v1330_v45, %v1300_v36  ;;  %v1308_v11 = vmul.f32 %v1276_v6, %v1276_v6  ;;  %v5247_v36 = vld [vmem:[#allocation26_spill] sm:$0xff] }
 0x292   :  { %v1281_v45 = vsub.f32 %v5247_v36, %v5035_v8 }
 0x293   :  { %v2746_v40 = vadd.f32 %v2745_v57, %v2715_v50  ;;  %v1272_v50 = vsub.f32 %v5239_v10, %v5035_v8  ;;  %v1302_v57 = vmul.f32 %v1270_v31, %v1270_v31  ;;  %v1332_v19 = vadd.f32 %v1331_v60, %v1301_v13 }
 0x294   :  { %v1311_v13 = vmul.f32 %v1279_v54, %v1279_v54 }
 0x295   :  { %v2747_v58 = vadd.f32 %v2746_v40, %v2716_v61  ;;  %v1303_v61 = vmul.f32 %v1271_v16, %v1271_v16  ;;  %v1333_v40 = vadd.f32 %v1332_v19, %v1302_v57  ;;  %v1304_v25 = vmul.f32 %v1272_v50, %v1272_v50 }
 0x296   :  { %v1283_v57 = vsub.f32 %v4969_v20, %v5035_v8  ;;  %v1313_v19 = vmul.f32 %v1281_v45, %v1281_v45 }
 0x297   :  { %v2748_v29 = vadd.f32 %v2747_v58, %v2717_v14  ;;  %v1334_v14 = vadd.f32 %v1333_v40, %v1303_v61  ;;  %v2725_v58 = vmul.f32 %v2693_v34, %v2693_v34  ;;  %v1284_v61 = vsub.f32 %v4980_v22, %v5035_v8 }
 0x299   :  { %v2749_v33 = vadd.f32 %v2748_v29, %v2718_v7  ;;  %v1335_v63 = vadd.f32 %v1334_v14, %v1304_v25  ;;  %v1306_v7 = vmul.f32 %v1274_v17, %v1274_v17 }
 0x29b   :  { %v2750_v44 = vadd.f32 %v2749_v33, %v2719_v12  ;;  %v1336_v29 = vadd.f32 %v1335_v63, %v1305_v42  ;;  %v5244_v33 = vld [vmem:[#allocation22_spill] sm:$0xff] }
 0x29c   :  { %v1278_v49 = vsub.f32 %v5244_v33, %v5035_v8 }
 0x29d   :  { %v2751_v43 = vadd.f32 %v2750_v44, %v2720_v39  ;;  %v1337_v35 = vadd.f32 %v1336_v29, %v1306_v7  ;;  %v1309_v39 = vmul.f32 %v1277_v4, %v1277_v4  ;;  %v5246_v44 = vld [vmem:[#allocation21_spill] sm:$0xff] }
 0x29e   :  { %v1280_v56 = vsub.f32 %v5246_v44, %v5035_v8  ;;  %v1310_v26 = vmul.f32 %v1278_v49, %v1278_v49 }
 0x29f   :  { %v2752_v28 = vadd.f32 %v2751_v43, %v2721_v59  ;;  %v1338_v21 = vadd.f32 %v1337_v35, %v1307_v23 }
 0x2a0   :  { %v1312_v10 = vmul.f32 %v1280_v56, %v1280_v56 }
 0x2a1   :  { %v2753_v37 = vadd.f32 %v2752_v28, %v2722_v5  ;;  %v1339_v24 = vadd.f32 %v1338_v21, %v1308_v11  ;;  %v5248_v5 = vld [vmem:[#allocation27_spill] sm:$0xff] }
 0x2a2   :  { %v1282_v28 = vsub.f32 %v5248_v5, %v5035_v8 }
 0x2a3   :  { %v2754_v38 = vadd.f32 %v2753_v37, %v2723_v62  ;;  %v1340_v41 = vadd.f32 %v1339_v24, %v1309_v39 }
 0x2a4   :  { %v1314_v20 = vmul.f32 %v1282_v28, %v1282_v28 }
 0x2a5   :  { %v2755_v15 = vadd.f32 %v2754_v38, %v2724_v9  ;;  %v1341_v60 = vadd.f32 %v1340_v41, %v1310_v26  ;;  %v1315_v38 = vmul.f32 %v1283_v57, %v1283_v57 }
 0x2a7   :  { %v2756_v27 = vadd.f32 %v2755_v15, %v2725_v58  ;;  %v1342_v50 = vadd.f32 %v1341_v60, %v1311_v13 }
 0x2a9   :  { %v2757_v47 = vrot.slane %v2756_v27, 4  ;;  %v1343_v37 = vadd.f32 %v1342_v50, %v1312_v10 }
 0x2ab   :  { %v2758_v12 = vadd.f32 %v2757_v47, %v2756_v27  ;;  %v1344_v40 = vadd.f32 %v1343_v37, %v1313_v19 }
 0x2ad   :  { %v2759_v53 = vrot.slane %v2758_v12, 2  ;;  %v1345_v2 = vadd.f32 %v1344_v40, %v1314_v20 }
 0x2af   :  { %v2760_v31 = vadd.f32 %v2759_v53, %v2758_v12  ;;  %v1346_v17 = vadd.f32 %v1345_v2, %v1315_v38 }
 0x2b1   :  { %v2761_v16 = vrot.slane %v2760_v31, 1 }
 0x2b3   :  { %v2762_v46 = vadd.f32 %v2761_v16, %v2760_v31 }
 0x2b5   :  { %v2763_v62 = vsel %vm1354_vm6, %v5004_v3, %v2762_v46  ;;  %v1316_v3 = vmul.f32 %v1284_v61, %v1284_v61 }
 0x2b6   :  { %3085 = vst [vmem:[%s5164_s3 + $0x2] sm:$0x3] %v2763_v62 }
 0x2b7   :  { %v3601_v59 = vpop.trf.xlu1  ;;  %v1347_v25 = vadd.f32 %v1346_v17, %v1316_v3 }
 0x2b8   :  { %v3605_v43 = vunpack.i.h.bf16 %v3601_v59  ;;  %v3602_v48 = vunpack.i.l.bf16 %v3601_v59 }
 0x2b9   :  { %v1348_v14 = vrot.slane %v1347_v25, 4 }
 0x2ba   :  { %v3089_v55 = vpack.c.bf16 %v3605_v43, %v3602_v48  ;;  %v3564_v34 = vpop.trf.xlu0 }
 0x2bb   :  { %v3568_v52 = vunpack.i.h.bf16 %v3564_v34  ;;  %v3565_v30 = vunpack.i.l.bf16 %v3564_v34  ;;  %v1349_v58 = vadd.f32 %v1348_v14, %v1347_v25 }
 0x2bc   :  { %3087 = vst [vmem:[%s5163_s2 + $0x8] sm:$0xff] %v3089_v55 }
 0x2bd   :  { %v3088_v9 = vpack.c.bf16 %v3568_v52, %v3565_v30  ;;  %v1350_v15 = vrot.slane %v1349_v58, 2 }
 0x2bf   :  { %1429 = vst [vmem:[%s5163_s2] sm:$0xff] %v3088_v9  ;;  %v1351_v0 = vadd.f32 %v1350_v15, %v1349_v58 }
 0x2c1   :  { %v1352_v18 = vrot.slane %v1351_v0, 1 }
 0x2c3   :  { %v1353_v42 = vadd.f32 %v1352_v18, %v1351_v0 }
 0x2c5   :  { %v1355_v22 = vsel %vm1354_vm6, %v5028_v51, %v1353_v42 }
 0x2c6   :  { %1356 = vst [vmem:[%s5164_s3] sm:$0x3] %v1355_v22 }

</bundles_post_ra>
